<compile_context>
chip_gen: v7x
topology: tpu7x:2x2x1
jax: 0.10.0
libtpu: 0.0.40
codegen_flags: <defaults>
</compile_context>

<pallas_src>
import functools

import jax
import jax.numpy as jnp
from jax import lax
from jax.experimental import pallas as pl
from jax.experimental.pallas import tpu as pltpu

_VMEM_LIMIT = 48 * 1024 * 1024  # above the 16/32 MiB scoped default, v7x-safe


def _round_up(x, m):
    return (x + m - 1) // m * m


def _pick_tile(dim, candidates):
    for c in candidates:
        if dim % c == 0:
            return c
    return dim


def _pad_to(x, shape):
    pads = [(0, s - d) for d, s in zip(x.shape, shape)]
    if any(p[1] for p in pads):
        return jnp.pad(x, pads)
    return x


# ----------------------------------------------------------------------------
# Stage 1 kernel: generic tiled (matmul + bias), grid=(M/tm, N/tn, K/tk).
# ----------------------------------------------------------------------------
def _dense_bias_kernel(x_ref, w_ref, b_ref, o_ref, acc_ref):
    @pl.when(pl.program_id(2) == 0)
    def _():
        acc_ref[...] = jnp.zeros_like(acc_ref)

    acc_ref[...] += jnp.dot(x_ref[...], w_ref[...],
                            preferred_element_type=jnp.float32)

    @pl.when(pl.program_id(2) == pl.num_programs(2) - 1)
    def _():
        o_ref[...] = (acc_ref[...] + b_ref[...]).astype(o_ref.dtype)


def dense(x, w, b):
    """x:(M,K) @ w:(K,N) + b:(N,) -> (M,N), f32 accumulation, tiled on TPU."""
    M, K = x.shape
    _, N = w.shape
    Mp, Kp, Np = _round_up(M, 8), _round_up(K, 128), _round_up(N, 128)
    tm = Mp if Mp <= 256 else _pick_tile(Mp, (256, 128, 64, 32, 16, 8))
    tk = Kp if Kp <= 512 else _pick_tile(Kp, (512, 384, 256, 128))
    tn = Np if Np <= 256 else _pick_tile(Np, (256, 128))

    xp = _pad_to(x, (Mp, Kp))
    wp = _pad_to(w, (Kp, Np))
    bp = _pad_to(b.reshape(1, -1).astype(jnp.float32), (1, Np))

    out = pl.pallas_call(
        _dense_bias_kernel,
        out_shape=jax.ShapeDtypeStruct((Mp, Np), jnp.float32),
        grid_spec=pltpu.PrefetchScalarGridSpec(
            num_scalar_prefetch=0,
            grid=(Mp // tm, Np // tn, Kp // tk),
            in_specs=[pl.BlockSpec((tm, tk), lambda i, j, k: (i, k)),
                      pl.BlockSpec((tk, tn), lambda i, j, k: (k, j)),
                      pl.BlockSpec((1, tn), lambda i, j, k: (0, j))],
            out_specs=pl.BlockSpec((tm, tn), lambda i, j, k: (i, j)),
            scratch_shapes=[pltpu.VMEM((tm, tn), jnp.float32)]),
        compiler_params=pltpu.CompilerParams(
            dimension_semantics=("parallel", "parallel", "arbitrary"),
            vmem_limit_bytes=_VMEM_LIMIT),
    )(xp, wp, bp)
    return out[:M, :N]


# ----------------------------------------------------------------------------
# Stage 2 kernel: GRU recurrence, one timestep per grid iteration.
#   gi_ref   (1, Bp, 3Gp)  precomputed input gates at step t (streamed)
#   h0_ref   (Bp, Gp)      initial hidden state (resident)
#   w_hh_ref (Gp, 3Gp)     hidden->gates weights (resident)
#   b_hh_ref (1, 3Gp)      hidden bias, only the n-gate part non-zero
#   h_all    (1, Bp, Gp)   hidden state of this step (streamed out)
#   h_fin    (Bp, Gp)      final hidden state (written on the last step)
#   h_carry  (Bp, Gp)      VMEM scratch carrying h across grid steps
# ----------------------------------------------------------------------------
def _gru_scan_kernel(gi_ref, h0_ref, w_hh_ref, b_hh_ref,
                     h_all_ref, h_fin_ref, h_carry):
    Gp = h0_ref.shape[1]
    t = pl.program_id(0)

    @pl.when(t == 0)
    def _():
        h_carry[...] = h0_ref[...]

    h = h_carry[...]
    gi = gi_ref[0]                                                 # (Bp, 3Gp)
    gh = jnp.dot(h, w_hh_ref[...],
                 preferred_element_type=jnp.float32) + b_hh_ref[...]

    # Gate slices are 128-aligned because Gp is a multiple of 128.
    i_r, i_z, i_n = gi[:, :Gp], gi[:, Gp:2 * Gp], gi[:, 2 * Gp:]
    h_r, h_z, h_n = gh[:, :Gp], gh[:, Gp:2 * Gp], gh[:, 2 * Gp:]
    r = jax.nn.sigmoid(i_r + h_r)          # i_r already holds b_ir + b_hr
    z = jax.nn.sigmoid(i_z + h_z)          # i_z already holds b_iz + b_hz
    n = jnp.tanh(i_n + r * h_n)            # h_n holds W_hn h + b_hn
    h_new = (1.0 - z) * n + z * h

    h_carry[...] = h_new
    h_all_ref[0] = h_new

    @pl.when(t == pl.num_programs(0) - 1)
    def _():
        h_fin_ref[...] = h_new


# ----------------------------------------------------------------------------
# Stage 3 kernel: vocab projection, tiled over V, writes logits batch-first.
#   h_ref (S, Bp, Gp) time-major hidden states (resident across V tiles)
#   w_ref (Gp, tv), b_ref (1, tv)
#   o_ref (Bp, S, tv) batch-first logits tile
# ----------------------------------------------------------------------------
def _proj_kernel(h_ref, w_ref, b_ref, o_ref):
    S, Bp, Gp = h_ref.shape
    h2d = h_ref[...].reshape(S * Bp, Gp)            # tile-aligned collapse
    y2d = jnp.dot(h2d, w_ref[...],
                  preferred_element_type=jnp.float32) + b_ref[...]
    y = y2d.reshape(S, Bp, -1)
    # In-VMEM time-major -> batch-first layout swap (no HBM transpose pass).
    for s in range(S):
        o_ref[:, s, :] = y[s]


# ----------------------------------------------------------------------------
# Wrapper: embedding gather (XLA glue) + the three Pallas stages.
# ----------------------------------------------------------------------------
@functools.partial(jax.jit, static_argnames=("gru_size",))
def rnnlm_forward(x, packed, gru_size, h_last=None):
    """x: (B, S) int32 token ids. Returns (logits (B,S,V) f32, h_final (B,G) f32)."""
    emb_p = packed["emb"]          # (V, Ep)
    w_ih_p = packed["w_ih"]        # (Ep, 3Gp)
    w_hh_p = packed["w_hh"]        # (Gp, 3Gp)
    b_gi_p = packed["b_gi"]        # (1, 3Gp)   b_ih with b_hh(r,z) folded in
    b_gh_p = packed["b_gh"]        # (1, 3Gp)   only the n-gate hidden bias
    w_out_p = packed["w_out"]      # (Gp, Vp)
    b_out_p = packed["b_out"]      # (1, Vp)

    B, S = x.shape
    V = emb_p.shape[0]
    G = gru_size
    Ep = emb_p.shape[1]
    Gp = w_hh_p.shape[0]
    Vp = w_out_p.shape[1]
    Bp = _round_up(B, 8)

    # Embedding gather (plain XLA), read time-major so no big transpose is needed.
    em_t = jnp.take(emb_p, x.T, axis=0)                        # (S, B, Ep)
    em_t = jnp.pad(em_t, ((0, 0), (0, Bp - B), (0, 0)))        # (S, Bp, Ep)

    # --- stage 1: batched input projection (hoisted out of the recurrence) ---
    gi_all = dense(em_t.reshape(S * Bp, Ep), w_ih_p, b_gi_p)   # (S*Bp, 3Gp)
    gi_all = gi_all.reshape(S, Bp, 3 * Gp)

    if h_last is None:
        h0 = jnp.zeros((Bp, Gp), jnp.float32)
    else:
        h0 = jnp.zeros((Bp, Gp), jnp.float32).at[:B, :G].set(
            h_last.astype(jnp.float32))

    # --- stage 2: sequential GRU recurrence, gridded over time ---------------
    h_all, h_fin = pl.pallas_call(
        _gru_scan_kernel,
        out_shape=(jax.ShapeDtypeStruct((S, Bp, Gp), jnp.float32),
                   jax.ShapeDtypeStruct((Bp, Gp), jnp.float32)),
        grid_spec=pltpu.PrefetchScalarGridSpec(
            num_scalar_prefetch=0,
            grid=(S,),
            in_specs=[pl.BlockSpec((1, Bp, 3 * Gp), lambda t: (t, 0, 0)),
                      pl.BlockSpec((Bp, Gp), lambda t: (0, 0)),
                      pl.BlockSpec((Gp, 3 * Gp), lambda t: (0, 0)),
                      pl.BlockSpec((1, 3 * Gp), lambda t: (0, 0))],
            out_specs=(pl.BlockSpec((1, Bp, Gp), lambda t: (t, 0, 0)),
                       pl.BlockSpec((Bp, Gp), lambda t: (0, 0))),
            scratch_shapes=[pltpu.VMEM((Bp, Gp), jnp.float32)]),
        compiler_params=pltpu.CompilerParams(
            dimension_semantics=("arbitrary",),
            vmem_limit_bytes=_VMEM_LIMIT),
    )(gi_all, h0, w_hh_p, b_gh_p)

    # --- stage 3: vocab projection, V-tiled, batch-first output --------------
    tv = Vp if Vp <= 512 else _pick_tile(Vp, (512, 256, 128))
    logits_p = pl.pallas_call(
        _proj_kernel,
        out_shape=jax.ShapeDtypeStruct((Bp, S, Vp), jnp.float32),
        grid_spec=pltpu.PrefetchScalarGridSpec(
            num_scalar_prefetch=0,
            grid=(Vp // tv,),
            in_specs=[pl.BlockSpec((S, Bp, Gp), lambda j: (0, 0, 0)),
                      pl.BlockSpec((Gp, tv), lambda j: (0, j)),
                      pl.BlockSpec((1, tv), lambda j: (0, j))],
            out_specs=pl.BlockSpec((Bp, S, tv), lambda j: (0, 0, j))),
        compiler_params=pltpu.CompilerParams(
            dimension_semantics=("parallel",),   # shards V across v7x's 2 TCs
            vmem_limit_bytes=_VMEM_LIMIT),
    )(h_all, w_out_p, b_out_p)

    return logits_p[:B, :, :V], h_fin[:B, :G]


# ----------------------------------------------------------------------------
# Parameter construction (PyTorch layout) and packing (padded / gate-aligned).
# ----------------------------------------------------------------------------
def make_params(key, vocab_size, emb_size, gru_size):
    """Raw params with the same shapes / semantics as the PyTorch module."""
    ks = jax.random.split(key, 7)
    scale = 0.1
    emb = scale * jax.random.normal(ks[0], (vocab_size, emb_size), jnp.float32)
    emb = emb.at[0].set(0.0)  # padding_idx=0 -> zero row, as in nn.Embedding
    w_ih = scale * jax.random.normal(ks[1], (3 * gru_size, emb_size), jnp.float32)
    w_hh = scale * jax.random.normal(ks[2], (3 * gru_size, gru_size), jnp.float32)
    b_ih = scale * jax.random.normal(ks[3], (3 * gru_size,), jnp.float32)
    b_hh = scale * jax.random.normal(ks[4], (3 * gru_size,), jnp.float32)
    w_out = scale * jax.random.normal(ks[5], (vocab_size, gru_size), jnp.float32)
    b_out = scale * jax.random.normal(ks[6], (vocab_size,), jnp.float32)
    return {"emb": emb, "w_ih": w_ih, "w_hh": w_hh, "b_ih": b_ih,
            "b_hh": b_hh, "w_out": w_out, "b_out": b_out}


def pack_params(raw, gru_size):
    """Transpose, pad (E/G/V -> lane multiples) and gate-align the weights."""
    # TODO(synk): optionally store w_out / w_ih / w_hh as bf16 (f32 accumulate)
    # to halve VMEM/HBM traffic at realistic vocab sizes.
    G = gru_size
    emb = raw["emb"]
    V, E = emb.shape
    Ep, Gp, Vp = _round_up(E, 128), _round_up(G, 128), _round_up(V, 128)

    emb_p = jnp.zeros((V, Ep), jnp.float32).at[:, :E].set(emb)

    def pack_gate_cols(w_t, rows_pad):              # (K, 3G) -> (rows_pad, 3Gp)
        K = w_t.shape[0]
        out = jnp.zeros((rows_pad, 3 * Gp), jnp.float32)
        for g in range(3):
            out = out.at[:K, g * Gp:g * Gp + G].set(w_t[:, g * G:(g + 1) * G])
        return out

    def pack_gate_vec(v):                           # (3G,) -> (1, 3Gp)
        out = jnp.zeros((1, 3 * Gp), jnp.float32)
        for g in range(3):
            out = out.at[0, g * Gp:g * Gp + G].set(v[g * G:(g + 1) * G])
        return out

    w_ih_p = pack_gate_cols(raw["w_ih"].T, Ep)      # (Ep, 3Gp)
    w_hh_p = pack_gate_cols(raw["w_hh"].T, Gp)      # (Gp, 3Gp)

    b_ih, b_hh = raw["b_ih"], raw["b_hh"]
    # Fold the hidden-side r/z biases into the precomputed input projection;
    # keep only the n-gate hidden bias in the recurrence (GRU semantics need it
    # inside r * (W_hn h + b_hn)).
    b_fold = jnp.concatenate([b_ih[:2 * G] + b_hh[:2 * G], b_ih[2 * G:]])
    b_hn_only = jnp.concatenate([jnp.zeros((2 * G,), jnp.float32), b_hh[2 * G:]])

    w_out_p = jnp.zeros((Gp, Vp), jnp.float32).at[:G, :V].set(raw["w_out"].T)
    b_out_p = jnp.zeros((1, Vp), jnp.float32).at[0, :V].set(raw["b_out"])

    return {"emb": emb_p, "w_ih": w_ih_p, "w_hh": w_hh_p,
            "b_gi": pack_gate_vec(b_fold), "b_gh": pack_gate_vec(b_hn_only),
            "w_out": w_out_p, "b_out": b_out_p}


# ----------------------------------------------------------------------------
# Pure-JAX reference (textbook PyTorch GRU math, raw params) for sanity check.
# ----------------------------------------------------------------------------
def rnnlm_forward_ref(x, raw, h_last=None):
    emb, w_ih, w_hh = raw["emb"], raw["w_ih"], raw["w_hh"]
    b_ih, b_hh = raw["b_ih"], raw["b_hh"]
    w_out, b_out = raw["w_out"], raw["b_out"]
    B, S = x.shape
    G = w_hh.shape[1]
    em = jnp.take(emb, x, axis=0)
    h = (jnp.zeros((B, G), jnp.float32) if h_last is None
         else h_last.astype(jnp.float32))

    def step(h, x_t):
        gi = x_t @ w_ih.T + b_ih
        gh = h @ w_hh.T + b_hh
        i_r, i_z, i_n = gi[:, :G], gi[:, G:2 * G], gi[:, 2 * G:]
        h_r, h_z, h_n = gh[:, :G], gh[:, G:2 * G], gh[:, 2 * G:]
        r = jax.nn.sigmoid(i_r + h_r)
        z = jax.nn.sigmoid(i_z + h_z)
        n = jnp.tanh(i_n + r * h_n)
        h_new = (1.0 - z) * n + z * h
        return h_new, h_new @ w_out.T + b_out

    h_final, logits_t = lax.scan(step, h, jnp.transpose(em, (1, 0, 2)))
    return jnp.transpose(logits_t, (1, 0, 2)), h_final


if __name__ == "__main__":
    VOCAB, EMB, GRU = 32, 32, 32
    B, S = 2, 8

    key = jax.random.PRNGKey(0)
    k_params, k_tokens = jax.random.split(key)
    raw = make_params(k_params, VOCAB, EMB, GRU)
    packed = pack_params(raw, GRU)
    x = jax.random.randint(k_tokens, (B, S), 0, VOCAB, dtype=jnp.int32)

    logits, h_final = rnnlm_forward(x, packed, gru_size=GRU)
    jax.block_until_ready((logits, h_final))

    # Sanity checks against the pure-JAX reference.
    logits_ref, h_ref = rnnlm_forward_ref(x, raw)
    assert logits.shape == (B, S, VOCAB) and h_final.shape == (B, GRU)
    assert jnp.allclose(logits, logits_ref, atol=1e-4, rtol=1e-4)
    assert jnp.allclose(h_final, h_ref, atol=1e-4, rtol=1e-4)

    # Also exercise the iterative-generation path (h_last provided).
    logits2, h2 = rnnlm_forward(x, packed, gru_size=GRU, h_last=h_final)
    jax.block_until_ready((logits2, h2))
    logits2_ref, h2_ref = rnnlm_forward_ref(x, raw, h_last=h_ref)
    assert jnp.allclose(logits2, logits2_ref, atol=1e-4, rtol=1e-4)
    assert jnp.allclose(h2, h2_ref, atol=1e-4, rtol=1e-4)

    print("KERNEL_OK")
</pallas_src>

<mosaic_0001>
module attributes {stable_mosaic.version = 11 : i64} {
  func.func @_dense_bias_kernel(%arg0: i32, %arg1: i32, %arg2: i32, %arg3: memref<64x128xf32, #tpu.memory_space<vmem>>, %arg4: memref<128x128xf32, #tpu.memory_space<vmem>>, %arg5: memref<1x128xf32, #tpu.memory_space<vmem>>, %arg6: memref<64x128xf32, #tpu.memory_space<vmem>>, %arg7: memref<64x128xf32, #tpu.memory_space<vmem>>) attributes {dimension_semantics = [#tpu.dimension_semantics<parallel>, #tpu.dimension_semantics<parallel>, #tpu.dimension_semantics<arbitrary>], iteration_bounds = array<i64: 1, 3, 1>, scalar_prefetch = 0 : i64, scratch_operands = 1 : i64, tpu.core_type = #tpu.core_type<tc>, window_params = [{transform_indices = @transform_0, window_bounds = array<i64: 64, 128>}, {transform_indices = @transform_1, window_bounds = array<i64: 128, 128>}, {transform_indices = @transform_2, window_bounds = array<i64: 1, 128>}, {transform_indices = @transform_3, window_bounds = array<i64: 64, 128>}]} {
    %c0_i32 = arith.constant 0 : i32
    %0 = arith.cmpi eq, %arg2, %c0_i32 : i32
    %1 = arith.extui %0 : i1 to i32
    %c0_i32_0 = arith.constant 0 : i32
    %2 = arith.cmpi ne, %1, %c0_i32_0 : i32
    scf.if %2 {
      %cst_10 = arith.constant 0.000000e+00 : f32
      %12 = vector.broadcast %cst_10 : f32 to vector<64x128xf32>
      %c0_11 = arith.constant 0 : index
      %c0_12 = arith.constant 0 : index
      %13 = vector.load %arg7[%c0_11, %c0_12] : memref<64x128xf32, #tpu.memory_space<vmem>>, vector<64x128xf32>
      tpu.vector_store %arg7[%c0_11, %c0_12], %12 {strides = array<i32>} : memref<64x128xf32, #tpu.memory_space<vmem>>, vector<64x128xf32>,
    } else {
    }
    %c0 = arith.constant 0 : index
    %c0_1 = arith.constant 0 : index
    %3 = vector.load %arg7[%c0, %c0_1] : memref<64x128xf32, #tpu.memory_space<vmem>>, vector<64x128xf32>
    %c0_2 = arith.constant 0 : index
    %c0_3 = arith.constant 0 : index
    %4 = vector.load %arg3[%c0_2, %c0_3] : memref<64x128xf32, #tpu.memory_space<vmem>>, vector<64x128xf32>
    %c0_4 = arith.constant 0 : index
    %c0_5 = arith.constant 0 : index
    %5 = vector.load %arg4[%c0_4, %c0_5] : memref<128x128xf32, #tpu.memory_space<vmem>>, vector<128x128xf32>
    %cst = arith.constant dense<0.000000e+00> : vector<64x128xf32>
    %6 = tpu.matmul %4, %5, %cst {dimension_numbers = #tpu.dot_dimension_numbers<[1], [0], [0], [1], [0, 0, 1, 1], [], []>} : vector<64x128xf32>, vector<128x128xf32>, vector<64x128xf32> -> vector<64x128xf32>
    %7 = arith.addf %3, %6 : vector<64x128xf32>
    %c0_6 = arith.constant 0 : index
    %c0_7 = arith.constant 0 : index
    %8 = vector.load %arg7[%c0_6, %c0_7] : memref<64x128xf32, #tpu.memory_space<vmem>>, vector<64x128xf32>
    tpu.vector_store %arg7[%c0_6, %c0_7], %7 {strides = array<i32>} : memref<64x128xf32, #tpu.memory_space<vmem>>, vector<64x128xf32>,
    %c0_i32_8 = arith.constant 0 : i32
    %9 = arith.cmpi eq, %arg2, %c0_i32_8 : i32
    %10 = arith.extui %9 : i1 to i32
    %c0_i32_9 = arith.constant 0 : i32
    %11 = arith.cmpi ne, %10, %c0_i32_9 : i32
    scf.if %11 {
      %c0_10 = arith.constant 0 : index
      %c0_11 = arith.constant 0 : index
      %12 = vector.load %arg7[%c0_10, %c0_11] : memref<64x128xf32, #tpu.memory_space<vmem>>, vector<64x128xf32>
      %c0_12 = arith.constant 0 : index
      %c0_13 = arith.constant 0 : index
      %13 = vector.load %arg5[%c0_12, %c0_13] : memref<1x128xf32, #tpu.memory_space<vmem>>, vector<1x128xf32>
      %14 = vector.broadcast %13 : vector<1x128xf32> to vector<64x128xf32>
      %15 = arith.addf %12, %14 : vector<64x128xf32>
      %c0_14 = arith.constant 0 : index
      %c0_15 = arith.constant 0 : index
      %16 = vector.load %arg6[%c0_14, %c0_15] : memref<64x128xf32, #tpu.memory_space<vmem>>, vector<64x128xf32>
      tpu.vector_store %arg6[%c0_14, %c0_15], %15 {strides = array<i32>} : memref<64x128xf32, #tpu.memory_space<vmem>>, vector<64x128xf32>,
    } else {
    }
    return
  }
  func.func @transform_0(%arg0: i32, %arg1: i32, %arg2: i32) -> (i32, i32) {
    %c0_i32 = arith.constant 0 : i32
    return %arg0, %arg2 : i32, i32
  }
  func.func @transform_1(%arg0: i32, %arg1: i32, %arg2: i32) -> (i32, i32) {
    %c0_i32 = arith.constant 0 : i32
    return %arg2, %arg1 : i32, i32
  }
  func.func @transform_2(%arg0: i32, %arg1: i32, %arg2: i32) -> (i32, i32) {
    %c0_i32 = arith.constant 0 : i32
    %c0_i32_0 = arith.constant 0 : i32
    return %c0_i32, %arg1 : i32, i32
  }
  func.func @transform_3(%arg0: i32, %arg1: i32, %arg2: i32) -> (i32, i32) {
    %c0_i32 = arith.constant 0 : i32
    return %arg0, %arg1 : i32, i32
  }
}

module attributes {stable_mosaic.version = 11 : i64} {
  func.func @_proj_kernel(%arg0: i32, %arg1: memref<8x8x128xf32, #tpu.memory_space<vmem>>, %arg2: memref<128x128xf32, #tpu.memory_space<vmem>>, %arg3: memref<1x128xf32, #tpu.memory_space<vmem>>, %arg4: memref<8x8x128xf32, #tpu.memory_space<vmem>>) attributes {dimension_semantics = [#tpu.dimension_semantics<parallel>], iteration_bounds = array<i64: 1>, scalar_prefetch = 0 : i64, scratch_operands = 0 : i64, tpu.core_type = #tpu.core_type<tc>, window_params = [{pipeline_mode = #tpu.pipeline_mode<synchronous>, transform_indices = @transform_0, window_bounds = array<i64: 8, 8, 128>}, {transform_indices = @transform_1, window_bounds = array<i64: 128, 128>}, {transform_indices = @transform_2, window_bounds = array<i64: 1, 128>}, {transform_indices = @transform_3, window_bounds = array<i64: 8, 8, 128>}]} {
    %c0 = arith.constant 0 : index
    %c0_0 = arith.constant 0 : index
    %c0_1 = arith.constant 0 : index
    %0 = vector.load %arg1[%c0, %c0_0, %c0_1] : memref<8x8x128xf32, #tpu.memory_space<vmem>>, vector<8x8x128xf32>
    %1 = vector.shape_cast %0 : vector<8x8x128xf32> to vector<64x128xf32>
    %c0_2 = arith.constant 0 : index
    %c0_3 = arith.constant 0 : index
    %2 = vector.load %arg2[%c0_2, %c0_3] : memref<128x128xf32, #tpu.memory_space<vmem>>, vector<128x128xf32>
    %cst = arith.constant dense<0.000000e+00> : vector<64x128xf32>
    %3 = tpu.matmul %1, %2, %cst {dimension_numbers = #tpu.dot_dimension_numbers<[1], [0], [0], [1], [0, 0, 1, 1], [], []>} : vector<64x128xf32>, vector<128x128xf32>, vector<64x128xf32> -> vector<64x128xf32>
    %c0_4 = arith.constant 0 : index
    %c0_5 = arith.constant 0 : index
    %4 = vector.load %arg3[%c0_4, %c0_5] : memref<1x128xf32, #tpu.memory_space<vmem>>, vector<1x128xf32>
    %5 = vector.broadcast %4 : vector<1x128xf32> to vector<64x128xf32>
    %6 = arith.addf %3, %5 : vector<64x128xf32>
    %7 = vector.shape_cast %6 : vector<64x128xf32> to vector<8x8x128xf32>
    %8 = vector.extract_strided_slice %7 {offsets = [0, 0, 0], sizes = [1, 8, 128], strides = [1, 1, 1]} : vector<8x8x128xf32> to vector<1x8x128xf32>
    %9 = vector.shape_cast %8 : vector<1x8x128xf32> to vector<8x128xf32>
    %c0_6 = arith.constant 0 : index
    %c0_7 = arith.constant 0 : index
    %c0_8 = arith.constant 0 : index
    %10 = vector.load %arg4[%c0_6, %c0_7, %c0_8] : memref<8x8x128xf32, #tpu.memory_space<vmem>>, vector<8x1x128xf32>
    %11 = vector.shape_cast %10 : vector<8x1x128xf32> to vector<8x128xf32>
    %12 = vector.shape_cast %9 : vector<8x128xf32> to vector<8x1x128xf32>
    tpu.vector_store %arg4[%c0_6, %c0_7, %c0_8], %12 {strides = array<i32>} : memref<8x8x128xf32, #tpu.memory_space<vmem>>, vector<8x1x128xf32>,
    %13 = vector.extract_strided_slice %7 {offsets = [1, 0, 0], sizes = [1, 8, 128], strides = [1, 1, 1]} : vector<8x8x128xf32> to vector<1x8x128xf32>
    %14 = vector.shape_cast %13 : vector<1x8x128xf32> to vector<8x128xf32>
    %c0_9 = arith.constant 0 : index
    %c1 = arith.constant 1 : index
    %c0_10 = arith.constant 0 : index
    %15 = vector.load %arg4[%c0_9, %c1, %c0_10] : memref<8x8x128xf32, #tpu.memory_space<vmem>>, vector<8x1x128xf32>
    %16 = vector.shape_cast %15 : vector<8x1x128xf32> to vector<8x128xf32>
    %17 = vector.shape_cast %14 : vector<8x128xf32> to vector<8x1x128xf32>
    tpu.vector_store %arg4[%c0_9, %c1, %c0_10], %17 {strides = array<i32>} : memref<8x8x128xf32, #tpu.memory_space<vmem>>, vector<8x1x128xf32>,
    %18 = vector.extract_strided_slice %7 {offsets = [2, 0, 0], sizes = [1, 8, 128], strides = [1, 1, 1]} : vector<8x8x128xf32> to vector<1x8x128xf32>
    %19 = vector.shape_cast %18 : vector<1x8x128xf32> to vector<8x128xf32>
    %c0_11 = arith.constant 0 : index
    %c2 = arith.constant 2 : index
    %c0_12 = arith.constant 0 : index
    %20 = vector.load %arg4[%c0_11, %c2, %c0_12] : memref<8x8x128xf32, #tpu.memory_space<vmem>>, vector<8x1x128xf32>
    %21 = vector.shape_cast %20 : vector<8x1x128xf32> to vector<8x128xf32>
    %22 = vector.shape_cast %19 : vector<8x128xf32> to vector<8x1x128xf32>
    tpu.vector_store %arg4[%c0_11, %c2, %c0_12], %22 {strides = array<i32>} : memref<8x8x128xf32, #tpu.memory_space<vmem>>, vector<8x1x128xf32>,
    %23 = vector.extract_strided_slice %7 {offsets = [3, 0, 0], sizes = [1, 8, 128], strides = [1, 1, 1]} : vector<8x8x128xf32> to vector<1x8x128xf32>
    %24 = vector.shape_cast %23 : vector<1x8x128xf32> to vector<8x128xf32>
    %c0_13 = arith.constant 0 : index
    %c3 = arith.constant 3 : index
    %c0_14 = arith.constant 0 : index
    %25 = vector.load %arg4[%c0_13, %c3, %c0_14] : memref<8x8x128xf32, #tpu.memory_space<vmem>>, vector<8x1x128xf32>
    %26 = vector.shape_cast %25 : vector<8x1x128xf32> to vector<8x128xf32>
    %27 = vector.shape_cast %24 : vector<8x128xf32> to vector<8x1x128xf32>
    tpu.vector_store %arg4[%c0_13, %c3, %c0_14], %27 {strides = array<i32>} : memref<8x8x128xf32, #tpu.memory_space<vmem>>, vector<8x1x128xf32>,
    %28 = vector.extract_strided_slice %7 {offsets = [4, 0, 0], sizes = [1, 8, 128], strides = [1, 1, 1]} : vector<8x8x128xf32> to vector<1x8x128xf32>
    %29 = vector.shape_cast %28 : vector<1x8x128xf32> to vector<8x128xf32>
    %c0_15 = arith.constant 0 : index
    %c4 = arith.constant 4 : index
    %c0_16 = arith.constant 0 : index
    %30 = vector.load %arg4[%c0_15, %c4, %c0_16] : memref<8x8x128xf32, #tpu.memory_space<vmem>>, vector<8x1x128xf32>
    %31 = vector.shape_cast %30 : vector<8x1x128xf32> to vector<8x128xf32>
    %32 = vector.shape_cast %29 : vector<8x128xf32> to vector<8x1x128xf32>
    tpu.vector_store %arg4[%c0_15, %c4, %c0_16], %32 {strides = array<i32>} : memref<8x8x128xf32, #tpu.memory_space<vmem>>, vector<8x1x128xf32>,
    %33 = vector.extract_strided_slice %7 {offsets = [5, 0, 0], sizes = [1, 8, 128], strides = [1, 1, 1]} : vector<8x8x128xf32> to vector<1x8x128xf32>
    %34 = vector.shape_cast %33 : vector<1x8x128xf32> to vector<8x128xf32>
    %c0_17 = arith.constant 0 : index
    %c5 = arith.constant 5 : index
    %c0_18 = arith.constant 0 : index
    %35 = vector.load %arg4[%c0_17, %c5, %c0_18] : memref<8x8x128xf32, #tpu.memory_space<vmem>>, vector<8x1x128xf32>
    %36 = vector.shape_cast %35 : vector<8x1x128xf32> to vector<8x128xf32>
    %37 = vector.shape_cast %34 : vector<8x128xf32> to vector<8x1x128xf32>
    tpu.vector_store %arg4[%c0_17, %c5, %c0_18], %37 {strides = array<i32>} : memref<8x8x128xf32, #tpu.memory_space<vmem>>, vector<8x1x128xf32>,
    %38 = vector.extract_strided_slice %7 {offsets = [6, 0, 0], sizes = [1, 8, 128], strides = [1, 1, 1]} : vector<8x8x128xf32> to vector<1x8x128xf32>
    %39 = vector.shape_cast %38 : vector<1x8x128xf32> to vector<8x128xf32>
    %c0_19 = arith.constant 0 : index
    %c6 = arith.constant 6 : index
    %c0_20 = arith.constant 0 : index
    %40 = vector.load %arg4[%c0_19, %c6, %c0_20] : memref<8x8x128xf32, #tpu.memory_space<vmem>>, vector<8x1x128xf32>
    %41 = vector.shape_cast %40 : vector<8x1x128xf32> to vector<8x128xf32>
    %42 = vector.shape_cast %39 : vector<8x128xf32> to vector<8x1x128xf32>
    tpu.vector_store %arg4[%c0_19, %c6, %c0_20], %42 {strides = array<i32>} : memref<8x8x128xf32, #tpu.memory_space<vmem>>, vector<8x1x128xf32>,
    %43 = vector.extract_strided_slice %7 {offsets = [7, 0, 0], sizes = [1, 8, 128], strides = [1, 1, 1]} : vector<8x8x128xf32> to vector<1x8x128xf32>
    %44 = vector.shape_cast %43 : vector<1x8x128xf32> to vector<8x128xf32>
    %c0_21 = arith.constant 0 : index
    %c7 = arith.constant 7 : index
    %c0_22 = arith.constant 0 : index
    %45 = vector.load %arg4[%c0_21, %c7, %c0_22] : memref<8x8x128xf32, #tpu.memory_space<vmem>>, vector<8x1x128xf32>
    %46 = vector.shape_cast %45 : vector<8x1x128xf32> to vector<8x128xf32>
    %47 = vector.shape_cast %44 : vector<8x128xf32> to vector<8x1x128xf32>
    tpu.vector_store %arg4[%c0_21, %c7, %c0_22], %47 {strides = array<i32>} : memref<8x8x128xf32, #tpu.memory_space<vmem>>, vector<8x1x128xf32>,
    return
  }
  func.func @transform_0(%arg0: i32) -> (i32, i32, i32) {
    %c0_i32 = arith.constant 0 : i32
    %c0_i32_0 = arith.constant 0 : i32
    %c0_i32_1 = arith.constant 0 : i32
    %c0_i32_2 = arith.constant 0 : i32
    return %c0_i32, %c0_i32_0, %c0_i32_1 : i32, i32, i32
  }
  func.func @transform_1(%arg0: i32) -> (i32, i32) {
    %c0_i32 = arith.constant 0 : i32
    %c0_i32_0 = arith.constant 0 : i32
    return %c0_i32, %arg0 : i32, i32
  }
  func.func @transform_2(%arg0: i32) -> (i32, i32) {
    %c0_i32 = arith.constant 0 : i32
    %c0_i32_0 = arith.constant 0 : i32
    return %c0_i32, %arg0 : i32, i32
  }
  func.func @transform_3(%arg0: i32) -> (i32, i32, i32) {
    %c0_i32 = arith.constant 0 : i32
    %c0_i32_0 = arith.constant 0 : i32
    %c0_i32_1 = arith.constant 0 : i32
    return %c0_i32, %c0_i32_0, %arg0 : i32, i32, i32
  }
}

module attributes {stable_mosaic.version = 11 : i64} {
  func.func @_gru_scan_kernel(%arg0: i32, %arg1: memref<1x8x384xf32, #tpu.memory_space<vmem>>, %arg2: memref<8x128xf32, #tpu.memory_space<vmem>>, %arg3: memref<128x384xf32, #tpu.memory_space<vmem>>, %arg4: memref<1x384xf32, #tpu.memory_space<vmem>>, %arg5: memref<1x8x128xf32, #tpu.memory_space<vmem>>, %arg6: memref<8x128xf32, #tpu.memory_space<vmem>>, %arg7: memref<8x128xf32, #tpu.memory_space<vmem>>) attributes {dimension_semantics = [#tpu.dimension_semantics<arbitrary>], iteration_bounds = array<i64: 8>, scalar_prefetch = 0 : i64, scratch_operands = 1 : i64, tpu.core_type = #tpu.core_type<tc>, window_params = [{transform_indices = @transform_0, window_bounds = array<i64: 1, 8, 384>}, {pipeline_mode = #tpu.pipeline_mode<synchronous>, transform_indices = @transform_1, window_bounds = array<i64: 8, 128>}, {pipeline_mode = #tpu.pipeline_mode<synchronous>, transform_indices = @transform_2, window_bounds = array<i64: 128, 384>}, {pipeline_mode = #tpu.pipeline_mode<synchronous>, transform_indices = @transform_3, window_bounds = array<i64: 1, 384>}, {transform_indices = @transform_4, window_bounds = array<i64: 1, 8, 128>}, {pipeline_mode = #tpu.pipeline_mode<synchronous>, transform_indices = @transform_5, window_bounds = array<i64: 8, 128>}]} {
    %c0_i32 = arith.constant 0 : i32
    %0 = arith.cmpi eq, %arg0, %c0_i32 : i32
    %1 = arith.extui %0 : i1 to i32
    %c0_i32_0 = arith.constant 0 : i32
    %2 = arith.cmpi ne, %1, %c0_i32_0 : i32
    scf.if %2 {
      %c0_18 = arith.constant 0 : index
      %c0_19 = arith.constant 0 : index
      %44 = vector.load %arg2[%c0_18, %c0_19] : memref<8x128xf32, #tpu.memory_space<vmem>>, vector<8x128xf32>
      %c0_20 = arith.constant 0 : index
      %c0_21 = arith.constant 0 : index
      %45 = vector.load %arg7[%c0_20, %c0_21] : memref<8x128xf32, #tpu.memory_space<vmem>>, vector<8x128xf32>
      tpu.vector_store %arg7[%c0_20, %c0_21], %44 {strides = array<i32>} : memref<8x128xf32, #tpu.memory_space<vmem>>, vector<8x128xf32>,
    } else {
    }
    %c0 = arith.constant 0 : index
    %c0_1 = arith.constant 0 : index
    %3 = vector.load %arg7[%c0, %c0_1] : memref<8x128xf32, #tpu.memory_space<vmem>>, vector<8x128xf32>
    %c0_2 = arith.constant 0 : index
    %c0_3 = arith.constant 0 : index
    %c0_4 = arith.constant 0 : index
    %4 = vector.load %arg1[%c0_2, %c0_3, %c0_4] : memref<1x8x384xf32, #tpu.memory_space<vmem>>, vector<1x8x384xf32>
    %5 = vector.shape_cast %4 : vector<1x8x384xf32> to vector<8x384xf32>
    %c0_5 = arith.constant 0 : index
    %c0_6 = arith.constant 0 : index
    %6 = vector.load %arg3[%c0_5, %c0_6] : memref<128x384xf32, #tpu.memory_space<vmem>>, vector<128x384xf32>
    %cst = arith.constant dense<0.000000e+00> : vector<8x384xf32>
    %7 = tpu.matmul %3, %6, %cst {dimension_numbers = #tpu.dot_dimension_numbers<[1], [0], [0], [1], [0, 0, 1, 1], [], []>} : vector<8x128xf32>, vector<128x384xf32>, vector<8x384xf32> -> vector<8x384xf32>
    %c0_7 = arith.constant 0 : index
    %c0_8 = arith.constant 0 : index
    %8 = vector.load %arg4[%c0_7, %c0_8] : memref<1x384xf32, #tpu.memory_space<vmem>>, vector<1x384xf32>
    %9 = vector.broadcast %8 : vector<1x384xf32> to vector<8x384xf32>
    %10 = arith.addf %7, %9 : vector<8x384xf32>
    %11 = vector.extract_strided_slice %5 {offsets = [0, 0], sizes = [8, 128], strides = [1, 1]} : vector<8x384xf32> to vector<8x128xf32>
    %12 = vector.extract_strided_slice %5 {offsets = [0, 128], sizes = [8, 128], strides = [1, 1]} : vector<8x384xf32> to vector<8x128xf32>
    %13 = vector.extract_strided_slice %5 {offsets = [0, 256], sizes = [8, 128], strides = [1, 1]} : vector<8x384xf32> to vector<8x128xf32>
    %14 = vector.extract_strided_slice %10 {offsets = [0, 0], sizes = [8, 128], strides = [1, 1]} : vector<8x384xf32> to vector<8x128xf32>
    %15 = vector.extract_strided_slice %10 {offsets = [0, 128], sizes = [8, 128], strides = [1, 1]} : vector<8x384xf32> to vector<8x128xf32>
    %16 = vector.extract_strided_slice %10 {offsets = [0, 256], sizes = [8, 128], strides = [1, 1]} : vector<8x384xf32> to vector<8x128xf32>
    %17 = arith.addf %11, %14 : vector<8x128xf32>
    %18 = arith.negf %17 : vector<8x128xf32>
    %19 = math.exp %18 : vector<8x128xf32>
    %cst_9 = arith.constant 1.000000e+00 : f32
    %20 = vector.broadcast %cst_9 : f32 to vector<8x128xf32>
    %21 = arith.addf %20, %19 : vector<8x128xf32>
    %22 = arith.divf %20, %21 : vector<8x128xf32>
    %23 = arith.addf %12, %15 : vector<8x128xf32>
    %24 = arith.negf %23 : vector<8x128xf32>
    %25 = math.exp %24 : vector<8x128xf32>
    %cst_10 = arith.constant 1.000000e+00 : f32
    %26 = vector.broadcast %cst_10 : f32 to vector<8x128xf32>
    %27 = arith.addf %26, %25 : vector<8x128xf32>
    %28 = arith.divf %26, %27 : vector<8x128xf32>
    %29 = arith.mulf %22, %16 : vector<8x128xf32>
    %30 = arith.addf %13, %29 : vector<8x128xf32>
    %31 = math.tanh %30 : vector<8x128xf32>
    %cst_11 = arith.constant 1.000000e+00 : f32
    %32 = vector.broadcast %cst_11 : f32 to vector<8x128xf32>
    %33 = arith.subf %32, %28 : vector<8x128xf32>
    %34 = arith.mulf %33, %31 : vector<8x128xf32>
    %35 = arith.mulf %28, %3 : vector<8x128xf32>
    %36 = arith.addf %34, %35 : vector<8x128xf32>
    %c0_12 = arith.constant 0 : index
    %c0_13 = arith.constant 0 : index
    %37 = vector.load %arg7[%c0_12, %c0_13] : memref<8x128xf32, #tpu.memory_space<vmem>>, vector<8x128xf32>
    tpu.vector_store %arg7[%c0_12, %c0_13], %36 {strides = array<i32>} : memref<8x128xf32, #tpu.memory_space<vmem>>, vector<8x128xf32>,
    %c0_14 = arith.constant 0 : index
    %c0_15 = arith.constant 0 : index
    %c0_16 = arith.constant 0 : index
    %38 = vector.load %arg5[%c0_14, %c0_15, %c0_16] : memref<1x8x128xf32, #tpu.memory_space<vmem>>, vector<1x8x128xf32>
    %39 = vector.shape_cast %38 : vector<1x8x128xf32> to vector<8x128xf32>
    %40 = vector.shape_cast %36 : vector<8x128xf32> to vector<1x8x128xf32>
    tpu.vector_store %arg5[%c0_14, %c0_15, %c0_16], %40 {strides = array<i32>} : memref<1x8x128xf32, #tpu.memory_space<vmem>>, vector<1x8x128xf32>,
    %c7_i32 = arith.constant 7 : i32
    %41 = arith.cmpi eq, %arg0, %c7_i32 : i32
    %42 = arith.extui %41 : i1 to i32
    %c0_i32_17 = arith.constant 0 : i32
    %43 = arith.cmpi ne, %42, %c0_i32_17 : i32
    scf.if %43 {
      %c0_18 = arith.constant 0 : index
      %c0_19 = arith.constant 0 : index
      %44 = vector.load %arg6[%c0_18, %c0_19] : memref<8x128xf32, #tpu.memory_space<vmem>>, vector<8x128xf32>
      tpu.vector_store %arg6[%c0_18, %c0_19], %36 {strides = array<i32>} : memref<8x128xf32, #tpu.memory_space<vmem>>, vector<8x128xf32>,
    } else {
    }
    return
  }
  func.func @transform_0(%arg0: i32) -> (i32, i32, i32) {
    %c0_i32 = arith.constant 0 : i32
    %c0_i32_0 = arith.constant 0 : i32
    %c0_i32_1 = arith.constant 0 : i32
    return %arg0, %c0_i32, %c0_i32_0 : i32, i32, i32
  }
  func.func @transform_1(%arg0: i32) -> (i32, i32) {
    %c0_i32 = arith.constant 0 : i32
    %c0_i32_0 = arith.constant 0 : i32
    %c0_i32_1 = arith.constant 0 : i32
    return %c0_i32, %c0_i32_0 : i32, i32
  }
  func.func @transform_2(%arg0: i32) -> (i32, i32) {
    %c0_i32 = arith.constant 0 : i32
    %c0_i32_0 = arith.constant 0 : i32
    %c0_i32_1 = arith.constant 0 : i32
    return %c0_i32, %c0_i32_0 : i32, i32
  }
  func.func @transform_3(%arg0: i32) -> (i32, i32) {
    %c0_i32 = arith.constant 0 : i32
    %c0_i32_0 = arith.constant 0 : i32
    %c0_i32_1 = arith.constant 0 : i32
    return %c0_i32, %c0_i32_0 : i32, i32
  }
  func.func @transform_4(%arg0: i32) -> (i32, i32, i32) {
    %c0_i32 = arith.constant 0 : i32
    %c0_i32_0 = arith.constant 0 : i32
    %c0_i32_1 = arith.constant 0 : i32
    return %arg0, %c0_i32, %c0_i32_0 : i32, i32, i32
  }
  func.func @transform_5(%arg0: i32) -> (i32, i32) {
    %c0_i32 = arith.constant 0 : i32
    %c0_i32_0 = arith.constant 0 : i32
    %c0_i32_1 = arith.constant 0 : i32
    return %c0_i32, %c0_i32_0 : i32, i32
  }
}

</mosaic_0001>

<bundles_post_ra>
// kernel: rnnlm_forward.3
= control target key start
LH: loop header
LB: loop body
LE: loop exit
PB: predicated region body
PF: predicated region fallthrough
CT: control target
= control target key end

     0   :  { %8 = vsyncpa [#allocation4], 0  ;;  %s1130_s0 = inlined_call_operand.vmem [shape: f32[64,128], index: 0, kind: input, shape index: {}]   ;;  %s1131_s1 = inlined_call_operand.hbm [shape: f32[128,384], index: 1, kind: input, shape index: {}]   ;;  %s1132_s2 = inlined_call_operand.vmem [shape: f32[1,384], index: 2, kind: input, shape index: {}]   ;;  %s1133_s3 = inlined_call_operand.vmem [shape: f32[64,384], index: 3, kind: output, shape index: {}]  }
   0x1   :  { %10 = vsyncpa [#allocation4 + $0x1], 0  ;;  %s929_s12 = smov 0   ;;  %s931_s13 = smov 0  }
   0x2   :  { %s933_s14 = smov 0   ;;  %s935_s15 = smov 0  }
   0x3   :  { %s937_s16 = smov 0   ;;  %s939_s17 = smov 0  }
   0x4 LB: > { %s634_s18 = sadd.s32 4294967295, %s903_s17   ;;  %s31_s19 = sadd.s32 1, %s899_s16  ;;  %s903_s17 = sphi %s939_s17, %s16_s17   ;;  %s899_s16 = sphi %s937_s16, %s1144_s16   ;;  %s895_s15 = sphi %s935_s15, %s1143_s15   ;;  %s891_s14 = sphi %s933_s14, %s1142_s14   ;;  %s887_s13 = sphi %s931_s13, %s1141_s13   ;;  %s883_s12 = sphi %s929_s12, %s1140_s12  }
   0x5   : > { %p33_p0 = scmp.ge.s32.totalorder %s31_s19, 3  ;;  %s72_s20 = sadd.s32 1, %s891_s14 }
   0x6   : > { %p79_p1 = scmp.ne.s32.totalorder %s891_s14, %s887_s13  ;;  %p80_p2 = scmp.eq.s32.totalorder %s903_s17, 0 }
   0x7   : > { %s1146_s19 = smov (%p33_p0, %s31_s19), 0  ;;  %p85_p4 = scmp.ne.s32.totalorder %s887_s13, %s883_s12 }
   0x8   : > { %p965_p3 = por %p80_p2, %p79_p1  ;;  %s68_s22 = ssub.s32 %s899_s16, %s1146_s19 }
   0x9   : > { %p86_p5 = scmp.eq.s32.totalorder %s634_s18, 0  ;;  %p70_p6 = scmp.eq.s32.totalorder %s68_s22, 0 }
   0xa   : > { %p137_p7 = scmp.eq.s32.totalorder %s634_s18, 2  ;;  %p771_p10 = scmp.lt.s32.totalorder %s903_s17, 3 }
   0xb   : > { %p972_p8 = por %p86_p5, %p85_p4  ;;  %s175_s26 = sand.u32 1, %s891_s14  }
   0xc   : > { %s977_s24 = scalar_select %p70_p6, %s891_s14, %s72_s20  }
   0xd   : > { %p979_p9 = por %p137_p7, %p79_p1  ;;  %s640_s27 = sshll.u32 %s899_s16, 7 }
   0xe   : > { %s639_s28 = sshll.u32 %s175_s26, 7  ;;  %s989_s4 = scalar_lea.hbm %s1131_s1, %s640_s27 }
   0xf   : > { %s1136_s25 = scalar_select %p979_p9, 1, 0 }
  0x10   : > { %s179_s5 = scalar_lea.vmem [#allocation3], %s639_s28  ;;  %p993_p11 = pnand %p771_p10, %p965_p3 }
  0x11   : > { %s188_s6 = sshll.u32 %s179_s5, 4  ;;  %s1000_s8 = scalar_lea.sflag [#allocation4], %s175_s26  ;;  %s997_s6 = int_to_ptr.vmem [resolvable:$true] %s188_s6 }
  0x12   : > { %s823_s9 = scalar_lea.hbm %s989_s4, 2048  ;;  %p825_p0 = pneg %p993_p11 }
  0x13   : > { %p824_p13 = scmp.ne.s32.totalorder %s989_s4, %s823_s9  ;;  %s828_s12 = scalar_lea.hbm %s1131_s1, 6144 }
  0x14   : > { %p829_p3 = scmp.lt.u32.totalorder %s989_s4, %s1131_s1  ;;  %p830_p4 = scmp.lt.u32.totalorder %s828_s12, %s823_s9 }
  0x15   : > { %p826_p1 = pnand %p825_p0, %p824_p13  ;;  %p832_p6 = scmp.lt.u32.totalorder %s823_s9, %s989_s4 }
  0x16   : > { %p831_p5 = por %p830_p4, %p829_p3 }
  0x17   : > { %p827_p2 = pneg %p826_p1 }
  0x18   : > { %p833_p7 = por %p832_p6, %p831_p5 }
  0x1a   : > { %p834_p10 = pnand %p833_p7, %p827_p2 }
  0x1c   : > { %837 = shalt.err (!%p834_p10)
}
  0x1d   : > { %s838_s21 = scalar_lea.vmem %s997_s6, 2048  ;;  %s905_s22 = smov [#allocation3]  }
  0x1e   : > { %p839_p13 = scmp.ne.s32.totalorder %s997_s6, %s838_s21  ;;  %s843_s26 = sshll.u32 %s905_s22, 4  ;;  %s844_s26 = int_to_ptr.vmem [resolvable:$false] %s843_s26 }
  0x1f   : > { %s845_s27 = scalar_lea.vmem %s844_s26, 4096  ;;  %p846_p9 = scmp.lt.s32.totalorder %s997_s6, %s844_s26 }
  0x20   : > { %p841_p1 = pnand %p839_p13, %p825_p0  ;;  %p847_p3 = scmp.lt.s32.totalorder %s845_s27, %s838_s21 }
  0x22   : > { %p842_p12 = pneg %p841_p1  ;;  %p848_p4 = por %p847_p3, %p846_p9 }
  0x24   : > { %p849_p5 = pnand %p848_p4, %p842_p12 }
  0x26   : > { %852 = shalt.err (!%p849_p5)
}
  0x27   : > { %s906_s28 = smov 384   ;;  %s907_s29 = smov 128  }
  0x28   : > { %s908_s30 = smov 8   ;;  %p202_p0 = scmp.lt.s32.totalorder %s903_s17, 4 }
  0x29   : > { %770 = dma.hbm_to_vmem [thread:$0]  (!%p993_p11), %s989_s4, 2048, %s997_s6, %s1000_s8, %s906_s28, %s907_s29, %s908_s30  }
  0x2a   : > { %p1138_p2 = scmp.ge.s32.totalorder %s903_s17, 1 }
  0x2c   : > { %p203_p6 = pnand %p1138_p2, %p202_p0 }
  0x2d   : > { %s1032_s5 = sand.u32 (!%p203_p6), 1, %s887_s13  }
  0x2e   : > { %206 = sbr.rel (%p203_p6) target bundleno = 318 (0x13e), region = 32  ;;  %s642_s9 = sshll.u32 (!%p203_p6), %s1032_s5, 7 }
  0x2f   : > { %s209_s10 = scalar_lea.sflag (!%p203_p6), [#allocation4], %s1032_s5  ;;  %s1036_s11 = scalar_lea.vmem (!%p203_p6), [#allocation3], %s642_s9 }
  0x35   : > { %878 = dma.done.wait (%p972_p8), %s209_s10, 2048  }
  0x36   : > { %880 = vsyncadd (%p972_p8), %s209_s10, 4294965248  ;;  %v287_v0 = vld [vmem:[%s1036_s11] sm:$0xff]  ;;  %v288_v1 = vld [vmem:[%s1036_s11 + $0x8] sm:$0xff]  ;;  %p255_p8 = scmp.lt.s32.totalorder %s895_s15, 2  ;;  %s643_s6 = sshll.u32 %s1032_s5, 6 }
  0x37   : > { %v289_v2 = vld [vmem:[%s1036_s11 + $0x10] sm:$0xff]  ;;  %v717_v3 = vpack.c.bf16 %v288_v1, %v287_v0  ;;  %v290_v4 = vld [vmem:[%s1036_s11 + $0x18] sm:$0xff]  ;;  %v291_v6 = vld [vmem:[%s1036_s11 + $0x20] sm:$0xff]  ;;  %s1088_s7 = scalar_lea.vmem [#allocation5], %s643_s6  ;;  %p1139_p9 = scmp.ne.s32.totalorder %s1136_s25, 0 }
  0x38   : > { %v721_v5 = vpack.c.bf16 %v290_v4, %v289_v2  ;;  %v292_v7 = vld [vmem:[%s1036_s11 + $0x28] sm:$0xff]  ;;  %v279_v9 = vld [vmem:[%s1130_s0] sm:$0xff]  ;;  %v293_v11 = vld [vmem:[%s1036_s11 + $0x30] sm:$0xff]  ;;  %s256_s10 = scalar_select %p255_p8, %s895_s15, 2 }
  0x39   : > { %718 = vmatprep.subr.bf16.mxu0 %v717_v3  ;;  %749 = vmatprep.subr.bf16.mxu1 %v717_v3  ;;  %v725_v8 = vpack.c.bf16 %v292_v7, %v291_v6  ;;  %v283_v10 = vld [vmem:[%s1130_s0 + $0x20] sm:$0xff]  ;;  %v294_v12 = vld [vmem:[%s1036_s11 + $0x38] sm:$0xff]  ;;  %v296_v15 = vld [vmem:[%s1036_s11 + $0x48] sm:$0xff]  ;;  %s646_s5 = sshll.u32 (%p1139_p9), %s895_s15, 3 }
  0x3a   : > { %720 = vmatpush3.bf16.msra.mxu0 %v717_v3  ;;  %757 = vmatpush3.bf16.msra.mxu1 %v717_v3  ;;  %v729_v13 = vpack.c.bf16 %v294_v12, %v293_v11  ;;  %v295_v14 = vld [vmem:[%s1036_s11 + $0x40] sm:$0xff]  ;;  %v297_v17 = vld [vmem:[%s1036_s11 + $0x50] sm:$0xff]  ;;  %v298_v18 = vld [vmem:[%s1036_s11 + $0x58] sm:$0xff]  ;;  %s257_s4 = scalar_lea.vmem %s1132_s2, %s256_s10  ;;  %s469_s18 = scalar_lea.vmem (%p1139_p9), %s1133_s3, %s646_s5 }
  0x3b   : > { %722 = vmatprep.subr.bf16.mxu0 %v721_v5  ;;  %750 = vmatprep.subr.bf16.mxu1 %v721_v5  ;;  %v733_v16 = vpack.c.bf16 %v296_v15, %v295_v14  ;;  %v737_v19 = vpack.c.bf16 %v298_v18, %v297_v17  ;;  %v299_v20 = vld [vmem:[%s1036_s11 + $0x60] sm:$0xff]  ;;  %v300_v21 = vld [vmem:[%s1036_s11 + $0x68] sm:$0xff]  ;;  %v301_v23 = vld [vmem:[%s1036_s11 + $0x70] sm:$0xff] }
  0x3c   : > { %705 = vmatprep.mubr.f32.mxu0 %v279_v9  ;;  %711 = vmatprep.mubr.f32.mxu1 %v283_v10  ;;  %v741_v22 = vpack.c.bf16 %v300_v21, %v299_v20  ;;  %v302_v24 = vld [vmem:[%s1036_s11 + $0x78] sm:$0xff]  ;;  %v280_v26 = vld [vmem:[%s1130_s0 + $0x8] sm:$0xff]  ;;  %v281_v28 = vld [vmem:[%s1130_s0 + $0x10] sm:$0xff] }
  0x3d   : > { %v745_v25 = vpack.c.bf16 %v302_v24, %v301_v23  ;;  %v284_v27 = vld [vmem:[%s1130_s0 + $0x28] sm:$0xff]  ;;  %v285_v29 = vld [vmem:[%s1130_s0 + $0x30] sm:$0xff]  ;;  %v282_v30 = vld [vmem:[%s1130_s0 + $0x18] sm:$0xff] }
  0x3e   : > { %724 = vmatpush3.bf16.msra.mxu0 %v721_v5  ;;  %758 = vmatpush3.bf16.msra.mxu1 %v721_v5  ;;  %v286_v31 = vld [vmem:[%s1130_s0 + $0x38] sm:$0xff]  ;;  %v644_v32 = vld [vmem:[%s257_s4] ss:$0 sm:$0xff] }
  0x3f   : > { %726 = vmatprep.subr.bf16.mxu0 %v725_v8  ;;  %751 = vmatprep.subr.bf16.mxu1 %v725_v8 }
  0x42   : > { %728 = vmatpush3.bf16.msra.mxu0 %v725_v8  ;;  %759 = vmatpush3.bf16.msra.mxu1 %v725_v8 }
  0x43   : > { %730 = vmatprep.subr.bf16.mxu0 %v729_v13  ;;  %752 = vmatprep.subr.bf16.mxu1 %v729_v13 }
  0x46   : > { %732 = vmatpush3.bf16.msra.mxu0 %v729_v13  ;;  %760 = vmatpush3.bf16.msra.mxu1 %v729_v13 }
  0x47   : > { %734 = vmatprep.subr.bf16.mxu0 %v733_v16  ;;  %753 = vmatprep.subr.bf16.mxu1 %v733_v16 }
  0x4a   : > { %736 = vmatpush3.bf16.msra.mxu0 %v733_v16  ;;  %761 = vmatpush3.bf16.msra.mxu1 %v733_v16 }
  0x4b   : > { %738 = vmatprep.subr.bf16.mxu0 %v737_v19  ;;  %754 = vmatprep.subr.bf16.mxu1 %v737_v19 }
  0x4e   : > { %740 = vmatpush3.bf16.msra.mxu0 %v737_v19  ;;  %762 = vmatpush3.bf16.msra.mxu1 %v737_v19 }
  0x4f   : > { %742 = vmatprep.subr.bf16.mxu0 %v741_v22  ;;  %755 = vmatprep.subr.bf16.mxu1 %v741_v22 }
  0x52   : > { %744 = vmatpush3.bf16.msra.mxu0 %v741_v22  ;;  %763 = vmatpush3.bf16.msra.mxu1 %v741_v22 }
  0x53   : > { %746 = vmatprep.subr.bf16.mxu0 %v745_v25  ;;  %756 = vmatprep.subr.bf16.mxu1 %v745_v25 }
  0x56   : > { %748 = vmatpush3.bf16.msra.mxu0 %v745_v25  ;;  %764 = vmatpush3.bf16.msra.mxu1 %v745_v25 }
  0x59   : > { %706 = vmatmul.mubr.f32.vlgmr.msra.gmra.mrb[0].mxu0 %v280_v26  ;;  %712 = vmatmul.mubr.f32.vlgmr.msra.gmra.mrb[0].mxu1 %v284_v27 }
  0x5a   : > { %708 = vmatprep.mubr.f32.mxu0 %v281_v28  ;;  %714 = vmatprep.mubr.f32.mxu1 %v285_v29 }
  0x5d   : > { %709 = vmatmul.mubr.f32.gmra.mrb[2].mxu0 %v282_v30  ;;  %715 = vmatmul.mubr.f32.gmra.mrb[2].mxu1 %v286_v31 }
 0x12c   : > { %v707_v33 = vpop.f32.mrb[0].mxu0  ;;  %v713_v34 = vpop.f32.mrb[0].mxu1 }
 0x12d   : > { %v443_v35 = vadd.f32 %v707_v33, %v644_v32  ;;  %v447_v36 = vadd.f32 %v713_v34, %v644_v32  ;;  %v369_v37 = vpop.f32.mrb[1].mxu0  ;;  %v389_v38 = vpop.f32.mrb[1].mxu1 }
 0x12e   : > { %v442_v39 = vadd.f32 %v644_v32, %v369_v37  ;;  %v446_v40 = vadd.f32 %v644_v32, %v389_v38  ;;  %464 = sbr.rel (!%p1139_p9) target bundleno = 318 (0x13e), region = 48 }
 0x12f   : > { %451 = vst [vmem:[%s1088_s7 + $0x8] sm:$0xff] %v443_v35  ;;  %455 = vst [vmem:[%s1088_s7 + $0x28] sm:$0xff] %v447_v36 }
 0x130   : > { %450 = vst [vmem:[%s1088_s7] sm:$0xff] %v442_v39  ;;  %454 = vst [vmem:[%s1088_s7 + $0x20] sm:$0xff] %v446_v40  ;;  %v710_v41 = vpop.f32.mrb[2].mxu0  ;;  %v716_v42 = vpop.f32.mrb[2].mxu1 }
 0x131   : > { %v445_v43 = vadd.f32 %v710_v41, %v644_v32  ;;  %v449_v44 = vadd.f32 %v716_v42, %v644_v32  ;;  %v379_v45 = vpop.f32.mrb[3].mxu0  ;;  %v399_v46 = vpop.f32.mrb[3].mxu1 }
 0x132   : > { %v444_v47 = vadd.f32 %v644_v32, %v379_v45  ;;  %v448_v48 = vadd.f32 %v644_v32, %v399_v46 }
 0x133   : > { %453 = vst [vmem:[%s1088_s7 + $0x18] sm:$0xff] %v445_v43  ;;  %457 = vst [vmem:[%s1088_s7 + $0x38] sm:$0xff] %v449_v44 }
 0x134   : > { %452 = vst [vmem:[%s1088_s7 + $0x10] sm:$0xff] %v444_v47  ;;  %456 = vst [vmem:[%s1088_s7 + $0x30] sm:$0xff] %v448_v48 }
 0x136   : > { %v513_v50 = vld [vmem:[%s1088_s7 + $0x8] sm:$0xff] }
 0x137   : > { %v511_v49 = vld [vmem:[%s1088_s7] sm:$0xff]  ;;  %v521_v54 = vld [vmem:[%s1088_s7 + $0x28] sm:$0xff]  ;;  %514 = vst [vmem:[%s469_s18 + $0x18] sm:$0xff] %v513_v50 }
 0x138   : > { %v519_v53 = vld [vmem:[%s1088_s7 + $0x20] sm:$0xff]  ;;  %512 = vst [vmem:[%s469_s18] sm:$0xff] %v511_v49  ;;  %522 = vst [vmem:[%s469_s18 + $0x78] sm:$0xff] %v521_v54 }
 0x139   : > { %520 = vst [vmem:[%s469_s18 + $0x60] sm:$0xff] %v519_v53 }
 0x13a   : > { %v517_v52 = vld [vmem:[%s1088_s7 + $0x18] sm:$0xff] }
 0x13b   : > { %v515_v51 = vld [vmem:[%s1088_s7 + $0x10] sm:$0xff]  ;;  %518 = vst [vmem:[%s469_s18 + $0x48] sm:$0xff] %v517_v52  ;;  %v525_v56 = vld [vmem:[%s1088_s7 + $0x38] sm:$0xff] }
 0x13c   : > { %516 = vst [vmem:[%s469_s18 + $0x30] sm:$0xff] %v515_v51  ;;  %v523_v55 = vld [vmem:[%s1088_s7 + $0x30] sm:$0xff]  ;;  %526 = vst [vmem:[%s469_s18 + $0xa8] sm:$0xff] %v525_v56 }
 0x13d   : > { %524 = vst [vmem:[%s469_s18 + $0x90] sm:$0xff] %v523_v55 }
 0x13e PF: > { %s16_s17 = sadd.s32 1, %s903_s17   ;;  %s1140_s12 = smov %s887_s13 }
 0x13f   : > { %p13_p11 = scmp.ge.s32.totalorder %s16_s17, 5   ;;  %s1141_s13 = smov %s891_s14 }
 0x140   : > { %s1142_s14 = smov %s977_s24  ;;  %s1143_s15 = smov %s899_s16 }
 0x141   : > { %s1144_s16 = smov %s1146_s19  ;;  %15 = sbr.rel (!%p13_p11) target bundleno = 4 (0x4), region = 124 }
 0x148   :  { %542 = vsyncpa [#allocation4], 1 }
 0x149   :  { %544 = vsyncpa [#allocation4 + $0x1], 1 }

// kernel: rnnlm_forward.4
= control target key start
LH: loop header
LB: loop body
LE: loop exit
PB: predicated region body
PF: predicated region fallthrough
CT: control target
= control target key end

     0   :  { %s708_s18 = smov 0   ;;  %s900_s0 = inlined_call_operand.vmem [shape: f32[8,8,384], index: 0, kind: input, shape index: {}]   ;;  %s901_s1 = inlined_call_operand.vmem [shape: f32[8,128], index: 1, kind: input, shape index: {}]   ;;  %s902_s2 = inlined_call_operand.vmem [shape: f32[128,384], index: 2, kind: input, shape index: {}]   ;;  %s903_s3 = inlined_call_operand.vmem [shape: f32[1,384], index: 3, kind: input, shape index: {}]   ;;  %s904_s4 = inlined_call_operand.vmem [shape: f32[8,8,128], index: 4, kind: output, shape index: {0}]   ;;  %s905_s5 = inlined_call_operand.vmem [shape: f32[8,128], index: 5, kind: output, shape index: {1}]  }
   0x1 LB: > { %s714_s19 = sadd.s32 4294967295, %s673_s18   ;;  %p528_p0 = scmp.ge.s32.totalorder %s673_s18, 1  ;;  %s673_s18 = sphi %s708_s18, %s16_s18  }
   0x2   : > { %p185_p1 = scmp.lt.s32.totalorder %s673_s18, 9 }
   0x4   : > { %p186_p2 = pnand %p528_p0, %p185_p1 }
   0x5   : > { %p212_p3 = scmp.lt.s32.totalorder (!%p186_p2), %s714_s19, 7  ;;  %p531_p4 = scmp.ne.s32.totalorder (!%p186_p2), %s714_s19, 0 }
   0x6   : > { %189 = sbr.rel (%p186_p2) target bundleno = 319 (0x13f), region = 36 }
   0xd   : > { %s213_s20 = scalar_select %p212_p3, %s714_s19, 7 }
   0xe   : > { %224 = sbr.rel (%p531_p4) target bundleno = 21 (0x15), region = 40  ;;  %v225_v0 = vld [vmem:[%s901_s1] sm:$0xff] (!%p531_p4) }
   0xf   : > { %s645_s21 = smul.u32 24, %s213_s20  ;;  %s530_s22 = sshll.u32 %s213_s20, 3  ;;  %226 = vst [vmem:[#allocation2] sm:$0xff] (!%p531_p4), %v225_v0 }
  0x10   : > { %s723_s25 = scalar_lea.vmem %s904_s4, %s530_s22 }
  0x11   : > { %s728_s28 = scalar_lea.vmem %s900_s0, %s645_s21 }
  0x15 PF: > { %v232_v1 = vld [vmem:[%s902_s2 + $0x8] sm:$0xff]  ;;  %v235_v2 = vld [vmem:[%s902_s2 + $0x20] sm:$0xff]  ;;  %v234_v5 = vld [vmem:[%s902_s2 + $0x18] sm:$0xff]  ;;  %v675_v8 = vmov 0.0|0.0   ;;  %v676_v9 = vmov 0.0   ;;  %vm677_vm0 = vmmov 0  }
  0x16   : > { %v231_v3 = vld [vmem:[%s902_s2] sm:$0xff]  ;;  %v589_v4 = vpack.c.bf16 %v235_v2, %v232_v1  ;;  %v238_v6 = vld [vmem:[%s902_s2 + $0x38] sm:$0xff]  ;;  %v241_v7 = vld [vmem:[%s902_s2 + $0x50] sm:$0xff]  ;;  %621 = vmatprep.subr.bf16.mxu1 %v675_v8  ;;  %360 = vmatprep.mubr.f32.mxu0 %v676_v9  ;;  %p534_p5 = scmp.ne.s32.totalorder %s714_s19, 7 }
  0x17   : > { %v591_v10 = vpack.c.bf16 %v234_v5, %v231_v3  ;;  %v593_v11 = vpack.c.bf16 %v241_v7, %v238_v6  ;;  %v237_v12 = vld [vmem:[%s902_s2 + $0x30] sm:$0xff]  ;;  %v240_v13 = vld [vmem:[%s902_s2 + $0x48] sm:$0xff]  ;;  %586 = vmatprep.mubr.msk.f32.mxu1 %vm677_vm0, %v676_v9  ;;  %v247_v15 = vld [vmem:[%s902_s2 + $0x80] sm:$0xff] }
  0x18   : > { %v244_v14 = vld [vmem:[%s902_s2 + $0x68] sm:$0xff]  ;;  %590 = vmatprep.subr.bf16.mxu0 %v589_v4  ;;  %v595_v16 = vpack.c.bf16 %v240_v13, %v237_v12  ;;  %v243_v18 = vld [vmem:[%s902_s2 + $0x60] sm:$0xff]  ;;  %v246_v19 = vld [vmem:[%s902_s2 + $0x78] sm:$0xff]  ;;  %v281_v13 = vlaneseq }
  0x19   : > { %592 = vmatpush1.bf16.msra.mxu0 %v591_v10  ;;  %v597_v17 = vpack.c.bf16 %v247_v15, %v244_v14  ;;  %v250_v20 = vld [vmem:[%s902_s2 + $0x98] sm:$0xff]  ;;  %v253_v21 = vld [vmem:[%s902_s2 + $0xb0] sm:$0xff]  ;;  %v599_v22 = vpack.c.bf16 %v246_v19, %v243_v18  ;;  %v252_v25 = vld [vmem:[%s902_s2 + $0xa8] sm:$0xff] }
  0x1a   : > { %594 = vmatprep.subr.bf16.mxu0 %v593_v11  ;;  %v601_v23 = vpack.c.bf16 %v253_v21, %v250_v20  ;;  %v249_v24 = vld [vmem:[%s902_s2 + $0x90] sm:$0xff]  ;;  %v256_v26 = vld [vmem:[%s902_s2 + $0xc8] sm:$0xff]  ;;  %v259_v27 = vld [vmem:[%s902_s2 + $0xe0] sm:$0xff]  ;;  %v282_v14 = vshrl.u32 %v281_v13, 7 }
  0x1b   : > { %v233_v28 = vld [vmem:[%s902_s2 + $0x10] sm:$0xff]  ;;  %v236_v29 = vld [vmem:[%s902_s2 + $0x28] sm:$0xff]  ;;  %v239_v31 = vld [vmem:[%s902_s2 + $0x40] sm:$0xff]  ;;  %v603_v32 = vpack.c.bf16 %v252_v25, %v249_v24  ;;  %v605_v34 = vpack.c.bf16 %v259_v27, %v256_v26 }
  0x1c   : > { %v622_v30 = vpack.c.bf16 %v236_v29, %v233_v28  ;;  %v242_v33 = vld [vmem:[%s902_s2 + $0x58] sm:$0xff]  ;;  %v255_v35 = vld [vmem:[%s902_s2 + $0xc0] sm:$0xff]  ;;  %v265_v39 = vld [vmem:[%s902_s2 + $0x110] sm:$0xff]  ;;  %v283_v15 = vsub.s32 0, %v282_v14 }
  0x1d   : > { %596 = vmatpush1.bf16.msra.mxu0 %v595_v16  ;;  %v258_v36 = vld [vmem:[%s902_s2 + $0xd8] sm:$0xff]  ;;  %v625_v38 = vpack.c.bf16 %v242_v33, %v239_v31  ;;  %v245_v40 = vld [vmem:[%s902_s2 + $0x70] sm:$0xff]  ;;  %v248_v41 = vld [vmem:[%s902_s2 + $0x88] sm:$0xff]  ;;  %v291_v33 = vsub.s32 2, %v282_v14 }
  0x1e   : > { %598 = vmatprep.subr.bf16.mxu0 %v597_v17  ;;  %v262_v37 = vld [vmem:[%s902_s2 + $0xf8] sm:$0xff]  ;;  %623 = vmatpush3.bf16.msra.mxu1 %v622_v30  ;;  %v607_v42 = vpack.c.bf16 %v258_v36, %v255_v35  ;;  %v261_v44 = vld [vmem:[%s902_s2 + $0xf0] sm:$0xff]  ;;  %v264_v45 = vld [vmem:[%s902_s2 + $0x108] sm:$0xff]  ;;  %v628_v47 = vpack.c.bf16 %v248_v41, %v245_v40  ;;  %v287_v17 = vsub.s32 1, %v282_v14 }
  0x1f   : > { %624 = vmatprep.subr.bf16.mxu1 %v675_v8  ;;  %v609_v43 = vpack.c.bf16 %v265_v39, %v262_v37  ;;  %v268_v46 = vld [vmem:[%s902_s2 + $0x128] sm:$0xff]  ;;  %v271_v48 = vld [vmem:[%s902_s2 + $0x140] sm:$0xff]  ;;  %v254_v50 = vld [vmem:[%s902_s2 + $0xb8] sm:$0xff]  ;;  %v611_v51 = vpack.c.bf16 %v264_v45, %v261_v44 }
  0x20   : > { %v251_v49 = vld [vmem:[%s902_s2 + $0xa0] sm:$0xff]  ;;  %v613_v52 = vpack.c.bf16 %v271_v48, %v268_v46  ;;  %v270_v54 = vld [vmem:[%s902_s2 + $0x138] sm:$0xff]  ;;  %v277_v57 = vld [vmem:[%s902_s2 + $0x170] sm:$0xff] }
  0x21   : > { %600 = vmatpush1.bf16.msra.mxu0 %v599_v22  ;;  %v267_v53 = vld [vmem:[%s902_s2 + $0x120] sm:$0xff]  ;;  %v274_v55 = vld [vmem:[%s902_s2 + $0x158] sm:$0xff]  ;;  %v631_v56 = vpack.c.bf16 %v254_v50, %v251_v49  ;;  %v257_v58 = vld [vmem:[%s902_s2 + $0xd0] sm:$0xff] }
  0x22   : > { %602 = vmatprep.subr.bf16.mxu0 %v601_v23  ;;  %626 = vmatpush3.bf16.msra.mxu1 %v625_v38  ;;  %v260_v59 = vld [vmem:[%s902_s2 + $0xe8] sm:$0xff]  ;;  %v615_v60 = vpack.c.bf16 %v270_v54, %v267_v53  ;;  %v617_v61 = vpack.c.bf16 %v277_v57, %v274_v55  ;;  %v273_v62 = vld [vmem:[%s902_s2 + $0x150] sm:$0xff]  ;;  %v263_v1 = vld [vmem:[%s902_s2 + $0x100] sm:$0xff] }
  0x23   : > { %627 = vmatprep.subr.bf16.mxu1 %v675_v8  ;;  %v276_v63 = vld [vmem:[%s902_s2 + $0x168] sm:$0xff]  ;;  %v634_v0 = vpack.c.bf16 %v260_v59, %v257_v58  ;;  %v266_v2 = vld [vmem:[%s902_s2 + $0x118] sm:$0xff]  ;;  %v269_v5 = vld [vmem:[%s902_s2 + $0x130] sm:$0xff] }
  0x24   : > { %v619_v3 = vpack.c.bf16 %v276_v63, %v273_v62  ;;  %v637_v4 = vpack.c.bf16 %v266_v2, %v263_v1  ;;  %v272_v6 = vld [vmem:[%s902_s2 + $0x148] sm:$0xff]  ;;  %v227_v7 = vld [vmem:[#allocation2] sm:$0xff]  ;;  %v278_v11 = vld [vmem:[%s902_s2 + $0x178] sm:$0xff] }
  0x25   : > { %604 = vmatpush1.bf16.msra.mxu0 %v603_v32  ;;  %v640_v9 = vpack.c.bf16 %v272_v6, %v269_v5  ;;  %v275_v10 = vld [vmem:[%s902_s2 + $0x160] sm:$0xff]  ;;  %v230_v39 = vld [vmem:[%s728_s28 + $0x10] sm:$0xff] }
  0x26   : > { %606 = vmatprep.subr.bf16.mxu0 %v605_v34  ;;  %629 = vmatpush3.bf16.msra.mxu1 %v628_v47  ;;  %v643_v12 = vpack.c.bf16 %v278_v11, %v275_v10  ;;  %v279_v16 = vld [vmem:[%s903_s3] sm:$0x7] }
  0x27   : > { %630 = vmatprep.subr.bf16.mxu1 %v675_v8  ;;  %v284_v18 = vrot.slane %v279_v16, %v283_v15  ;;  %v288_v19 = vrot.slane %v279_v16, %v287_v17  ;;  %v228_v20 = vld [vmem:[%s728_s28] sm:$0xff]  ;;  %v292_v34 = vrot.slane %v279_v16, %v291_v33 }
  0x29   : > { %608 = vmatpush1.bf16.msra.mxu0 %v607_v42 }
  0x2a   : > { %610 = vmatprep.subr.bf16.mxu0 %v609_v43  ;;  %632 = vmatpush3.bf16.msra.mxu1 %v631_v56 }
  0x2b   : > { %633 = vmatprep.subr.bf16.mxu1 %v675_v8 }
  0x2d   : > { %612 = vmatpush1.bf16.msra.mxu0 %v611_v51 }
  0x2e   : > { %614 = vmatprep.subr.bf16.mxu0 %v613_v52  ;;  %635 = vmatpush3.bf16.msra.mxu1 %v634_v0 }
  0x2f   : > { %636 = vmatprep.subr.bf16.mxu1 %v675_v8 }
  0x31   : > { %616 = vmatpush1.bf16.msra.mxu0 %v615_v60 }
  0x32   : > { %618 = vmatprep.subr.bf16.mxu0 %v617_v61  ;;  %638 = vmatpush3.bf16.msra.mxu1 %v637_v4 }
  0x33   : > { %639 = vmatprep.subr.bf16.mxu1 %v675_v8 }
  0x35   : > { %620 = vmatpush1.bf16.msra.mxu0 %v619_v3 }
  0x36   : > { %641 = vmatpush3.bf16.msra.mxu1 %v640_v9 }
  0x37   : > { %642 = vmatprep.subr.bf16.mxu1 %v675_v8  ;;  %v229_v8 = vld [vmem:[%s728_s28 + $0x8] sm:$0xff] }
  0x38   : > { %361 = vmatmul.mubr.f32.vlgmr.msra.gmra.mrb[0].mxu0 %v227_v7 }
  0x3a   : > { %644 = vmatpush3.bf16.msra.mxu1 %v643_v12 }
  0x3d   : > { %587 = vmatmul.mubr.f32.vlgmr.msra.gmra.mrb[0].mxu1 %v227_v7 }
 0x10b   : > { %v362_v21 = vpop.f32.mrb[0].mxu0 }
 0x10c   : > { %v363_v22 = vadd.f32 %v362_v21, %v284_v18  ;;  %v364_v23 = vpop.f32.mrb[1].mxu0 }
 0x10d   : > { %v365_v24 = vadd.f32 %v364_v23, %v288_v19 }
 0x10e   : > { %v437_v25 = vadd.f32 %v363_v22, %v228_v20 }
 0x10f   : > { %v444_v27 = vadd.f32 %v365_v24, %v229_v8 }
 0x110   : > { %v532_v26 = vmul.f32 -1.442695, %v437_v25  ;;  %v433_v28 = vpop.f32.mrb[0].mxu1 }
 0x111   : > { %v533_v29 = vmul.f32 -1.442695, %v444_v27  ;;  %v588_v30 = vpop.f32.mrb[1].mxu1  ;;  %v434_v37 = vadd.f32 %v433_v28, %v292_v34 }
 0x112   : > { %657 = vpow2.f32 %v532_v26 }
 0x113   : > { %659 = vpow2.f32 %v533_v29 }
 0x11c   : > { %v658_v31 = vpop.eup %657 }
 0x11d   : > { %v441_v32 = vadd.f32 1.0, %v658_v31  ;;  %v660_v35 = vpop.eup %659 }
 0x11e   : > { %v448_v36 = vadd.f32 1.0, %v660_v35 }
 0x11f   : > { %661 = vrcp.f32 %v441_v32 }
 0x120   : > { %663 = vrcp.f32 %v448_v36 }
 0x129   : > { %v662_v38 = vpop.eup %661 }
 0x12a   : > { %v451_v40 = vmul.f32 %v662_v38, %v434_v37  ;;  %v664_v42 = vpop.eup %663 }
 0x12b   : > { %v454_v43 = vsub.f32 1.0, %v664_v42  ;;  %v456_v45 = vmul.f32 %v664_v42, %v227_v7 }
 0x12c   : > { %v452_v41 = vadd.f32 %v451_v40, %v230_v39 }
 0x12e   : > { %665 = vtanh.f32 %v452_v41 }
 0x137   : > { %463 = sbr.rel (%p534_p5) target bundleno = 319 (0x13f), region = 44 }
 0x138   : > { %v666_v44 = vpop.eup %665 }
 0x139   : > { %v455_v46 = vmul.f32 %v666_v44, %v454_v43 }
 0x13b   : > { %v457_v47 = vadd.f32 %v456_v45, %v455_v46 }
 0x13d   : > { %458 = vst [vmem:[#allocation2] sm:$0xff] %v457_v47  ;;  %459 = vst [vmem:[%s723_s25] sm:$0xff] %v457_v47 }
 0x13e   : > { %464 = vst [vmem:[%s905_s5] sm:$0xff] %v457_v47 }
 0x13f PF: > { %s16_s18 = sadd.s32 1, %s673_s18  }
 0x140   : > { %p13_p6 = scmp.ge.s32.totalorder %s16_s18, 10  }
 0x142   :  { %15 = sbr.rel (!%p13_p6) target bundleno = 1 (0x1), region = 82 }

// kernel: rnnlm_forward.5
= control target key start
LH: loop header
LB: loop body
LE: loop exit
PB: predicated region body
PF: predicated region fallthrough
CT: control target
= control target key end

     0   :  { %v832_v32 = vmov 1966171168   ;;  %v155_v34 = vlaneseq  ;;  %s1202_s1 = inlined_call_operand.vmem [shape: f32[128,128], index: 1, kind: input, shape index: {}]   ;;  %s1203_s0 = inlined_call_operand.vmem [shape: f32[8,8,128], index: 0, kind: input, shape index: {}]   ;;  %s1204_s2 = inlined_call_operand.vmem [shape: f32[1,128], index: 2, kind: input, shape index: {}]   ;;  %s1205_s3 = inlined_call_operand.vmem [shape: f32[8,8,128], index: 3, kind: output, shape index: {}]  }
   0x1   :  { %v22_v0 = vld [vmem:[%s1202_s1] sm:$0xff]  ;;  %v23_v1 = vld [vmem:[%s1202_s1 + $0x8] sm:$0xff]  ;;  %v24_v2 = vld [vmem:[%s1202_s1 + $0x10] sm:$0xff]  ;;  %v153_v33 = vunpack.c.l.s4 %v832_v32 }
   0x2   :  { %v783_v3 = vpack.c.bf16 %v23_v1, %v22_v0  ;;  %v25_v4 = vld [vmem:[%s1202_s1 + $0x18] sm:$0xff]  ;;  %v26_v6 = vld [vmem:[%s1202_s1 + $0x20] sm:$0xff]  ;;  %v27_v7 = vld [vmem:[%s1202_s1 + $0x28] sm:$0xff]  ;;  %v156_v36 = vshrl.u32 %v155_v34, 7 }
   0x3   :  { %v787_v5 = vpack.c.bf16 %v25_v4, %v24_v2  ;;  %v791_v8 = vpack.c.bf16 %v27_v7, %v26_v6  ;;  %v14_v9 = vld [vmem:[%s1203_s0] sm:$0xff]  ;;  %v28_v11 = vld [vmem:[%s1202_s1 + $0x30] sm:$0xff]  ;;  %v29_v12 = vld [vmem:[%s1202_s1 + $0x38] sm:$0xff]  ;;  %v154_v35 = vunpack.c.0.s8 %v153_v33 }
   0x4   :  { %784 = vmatprep.subr.bf16.mxu0 %v783_v3  ;;  %815 = vmatprep.subr.bf16.mxu1 %v783_v3  ;;  %v18_v10 = vld [vmem:[%s1203_s0 + $0x20] sm:$0xff]  ;;  %v795_v13 = vpack.c.bf16 %v29_v12, %v28_v11  ;;  %v31_v15 = vld [vmem:[%s1202_s1 + $0x48] sm:$0xff]  ;;  %v32_v17 = vld [vmem:[%s1202_s1 + $0x50] sm:$0xff] }
   0x5   :  { %786 = vmatpush3.bf16.msra.mxu0 %v783_v3  ;;  %823 = vmatpush3.bf16.msra.mxu1 %v783_v3  ;;  %v30_v14 = vld [vmem:[%s1202_s1 + $0x40] sm:$0xff]  ;;  %v33_v18 = vld [vmem:[%s1202_s1 + $0x58] sm:$0xff]  ;;  %v35_v21 = vld [vmem:[%s1202_s1 + $0x68] sm:$0xff]  ;;  %v930_v38 = vsub.s32 %v154_v35, %v156_v36 }
   0x6   :  { %788 = vmatprep.subr.bf16.mxu0 %v787_v5  ;;  %816 = vmatprep.subr.bf16.mxu1 %v787_v5  ;;  %v799_v16 = vpack.c.bf16 %v31_v15, %v30_v14  ;;  %v803_v19 = vpack.c.bf16 %v33_v18, %v32_v17  ;;  %v34_v20 = vld [vmem:[%s1202_s1 + $0x60] sm:$0xff]  ;;  %v36_v23 = vld [vmem:[%s1202_s1 + $0x70] sm:$0xff]  ;;  %v37_v24 = vld [vmem:[%s1202_s1 + $0x78] sm:$0xff] }
   0x7   :  { %771 = vmatprep.mubr.f32.mxu0 %v14_v9  ;;  %777 = vmatprep.mubr.f32.mxu1 %v18_v10  ;;  %v807_v22 = vpack.c.bf16 %v35_v21, %v34_v20  ;;  %v811_v25 = vpack.c.bf16 %v37_v24, %v36_v23  ;;  %v15_v26 = vld [vmem:[%s1203_s0 + $0x8] sm:$0xff]  ;;  %v16_v28 = vld [vmem:[%s1203_s0 + $0x10] sm:$0xff]  ;;  %v17_v30 = vld [vmem:[%s1203_s0 + $0x18] sm:$0xff] }
   0x8   :  { %v19_v27 = vld [vmem:[%s1203_s0 + $0x28] sm:$0xff]  ;;  %v20_v29 = vld [vmem:[%s1203_s0 + $0x30] sm:$0xff]  ;;  %v21_v31 = vld [vmem:[%s1203_s0 + $0x38] sm:$0xff] }
   0x9   :  { %790 = vmatpush3.bf16.msra.mxu0 %v787_v5  ;;  %824 = vmatpush3.bf16.msra.mxu1 %v787_v5  ;;  %v928_v37 = vld [vmem:[%s1204_s2] ss:$0 sm:$0xff] }
   0xa   :  { %792 = vmatprep.subr.bf16.mxu0 %v791_v8  ;;  %817 = vmatprep.subr.bf16.mxu1 %v791_v8 }
   0xd   :  { %794 = vmatpush3.bf16.msra.mxu0 %v791_v8  ;;  %825 = vmatpush3.bf16.msra.mxu1 %v791_v8 }
   0xe   :  { %796 = vmatprep.subr.bf16.mxu0 %v795_v13  ;;  %818 = vmatprep.subr.bf16.mxu1 %v795_v13 }
  0x11   :  { %798 = vmatpush3.bf16.msra.mxu0 %v795_v13  ;;  %826 = vmatpush3.bf16.msra.mxu1 %v795_v13 }
  0x12   :  { %800 = vmatprep.subr.bf16.mxu0 %v799_v16  ;;  %819 = vmatprep.subr.bf16.mxu1 %v799_v16 }
  0x15   :  { %802 = vmatpush3.bf16.msra.mxu0 %v799_v16  ;;  %827 = vmatpush3.bf16.msra.mxu1 %v799_v16 }
  0x16   :  { %804 = vmatprep.subr.bf16.mxu0 %v803_v19  ;;  %820 = vmatprep.subr.bf16.mxu1 %v803_v19 }
  0x19   :  { %806 = vmatpush3.bf16.msra.mxu0 %v803_v19  ;;  %828 = vmatpush3.bf16.msra.mxu1 %v803_v19 }
  0x1a   :  { %808 = vmatprep.subr.bf16.mxu0 %v807_v22  ;;  %821 = vmatprep.subr.bf16.mxu1 %v807_v22 }
  0x1d   :  { %810 = vmatpush3.bf16.msra.mxu0 %v807_v22  ;;  %829 = vmatpush3.bf16.msra.mxu1 %v807_v22 }
  0x1e   :  { %812 = vmatprep.subr.bf16.mxu0 %v811_v25  ;;  %822 = vmatprep.subr.bf16.mxu1 %v811_v25 }
  0x21   :  { %814 = vmatpush3.bf16.msra.mxu0 %v811_v25  ;;  %830 = vmatpush3.bf16.msra.mxu1 %v811_v25 }
  0x24   :  { %772 = vmatmul.mubr.f32.vlgmr.msra.gmra.mrb[0].mxu0 %v15_v26  ;;  %778 = vmatmul.mubr.f32.vlgmr.msra.gmra.mrb[0].mxu1 %v19_v27 }
  0x25   :  { %774 = vmatprep.mubr.f32.mxu0 %v16_v28  ;;  %780 = vmatprep.mubr.f32.mxu1 %v20_v29 }
  0x28   :  { %775 = vmatmul.mubr.f32.gmra.mrb[2].mxu0 %v17_v30  ;;  %781 = vmatmul.mubr.f32.gmra.mrb[2].mxu1 %v21_v31 }
  0xf7   :  { %v773_v39 = vpop.f32.mrb[0].mxu0  ;;  %v779_v40 = vpop.f32.mrb[0].mxu1 }
  0xf8   :  { %v117_v41 = vadd.f32 %v773_v39, %v928_v37  ;;  %v137_v42 = vadd.f32 %v779_v40, %v928_v37  ;;  %v111_v43 = vpop.f32.mrb[1].mxu0  ;;  %v131_v44 = vpop.f32.mrb[1].mxu1 }
  0xf9   :  { %v112_v45 = vadd.f32 %v928_v37, %v111_v43  ;;  %v936_v46 = vadd.f32 %v928_v37, %v131_v44 }
  0xfa   :  { %v217_v47 = vcombine.high %v117_v41, %v117_v41  ;;  %v224_v48 = vrot.slane %v117_v41, %v930_v38  ;;  %v481_v49 = vcombine.high %v137_v42, %v137_v42  ;;  %v488_v50 = vrot.slane %v137_v42, %v930_v38 }
  0xfb   :  { %v151_v51 = vcombine.high %v112_v45, %v112_v45  ;;  %v158_v52 = vrot.slane %v112_v45, %v930_v38  ;;  %v415_v53 = vcombine.high %v936_v46, %v936_v46  ;;  %v422_v54 = vrot.slane %v936_v46, %v930_v38  ;;  %v945_v55 = vpop.f32.mrb[2].mxu0  ;;  %v947_v56 = vpop.f32.mrb[2].mxu1 }
  0xfc   :  { %v231_v57 = vrot.slane %v217_v47, %v930_v38  ;;  %v232_v58 = vcombine.high %v224_v48, %v224_v48  ;;  %v240_v59 = vrot.slane %v224_v48, %v930_v38  ;;  %687 = vst.sshfl [vmem:[%s1205_s3 + $0x1] sm:$0x1 pattern:$0x73625140] %v224_v48  ;;  %v495_v60 = vrot.slane %v481_v49, %v930_v38  ;;  %v958_v61 = vpop.f32.mrb[3].mxu0  ;;  %v960_v62 = vpop.f32.mrb[3].mxu1 }
  0xfd   :  { %703 = vst.sshfl [vmem:[%s1205_s3 + $0x5] sm:$0x1 pattern:$0x73625140] %v488_v50  ;;  %v496_v63 = vcombine.high %v488_v50, %v488_v50  ;;  %v504_v0 = vrot.slane %v488_v50, %v930_v38  ;;  %v165_v1 = vrot.slane %v151_v51, %v930_v38  ;;  %v166_v2 = vcombine.high %v158_v52, %v158_v52 }
  0xfe   :  { %683 = vst.sshfl [vmem:[%s1205_s3] sm:$0x1 pattern:$0x73625140] %v158_v52  ;;  %v233_v3 = vcombine.high %v231_v57, %v231_v57  ;;  %v247_v4 = vrot.slane %v231_v57, %v930_v38  ;;  %v254_v5 = vrot.slane %v232_v58, %v930_v38  ;;  %v262_v6 = vcombine.high %v240_v59, %v240_v59 }
  0xff   :  { %699 = vst.sshfl [vmem:[%s1205_s3 + $0x4] sm:$0x1 pattern:$0x73625140] %v422_v54  ;;  %v497_v7 = vcombine.high %v495_v60, %v495_v60  ;;  %v511_v8 = vrot.slane %v495_v60, %v930_v38  ;;  %v518_v9 = vrot.slane %v496_v63, %v930_v38  ;;  %v526_v10 = vcombine.high %v504_v0, %v504_v0 }
 0x100   :  { %688 = vst.sshfl [vmem:[%s1205_s3 + $0x9] sm:$0x1 pattern:$0x73625140] %v232_v58  ;;  %v261_v11 = vrot.slane %v233_v3, %v930_v38  ;;  %v263_v12 = vcombine.high %v247_v4, %v247_v4  ;;  %v264_v13 = vcombine.high %v254_v5, %v254_v5  ;;  %276 = vst [vmem:[%s1205_s3 + $0x11] sm:$0x1] %v262_v6 }
 0x101   :  { %689 = vst.sshfl [vmem:[%s1205_s3 + $0x21] sm:$0x1 pattern:$0x73625140] %v231_v57  ;;  %v167_v14 = vcombine.high %v165_v1, %v165_v1  ;;  %v525_v15 = vrot.slane %v497_v7, %v930_v38  ;;  %v527_v16 = vcombine.high %v511_v8, %v511_v8  ;;  %v528_v17 = vcombine.high %v518_v9, %v518_v9 }
 0x102   :  { %705 = vst.sshfl [vmem:[%s1205_s3 + $0x25] sm:$0x1 pattern:$0x73625140] %v495_v60  ;;  %540 = vst [vmem:[%s1205_s3 + $0x15] sm:$0x1] %v526_v10  ;;  %v174_v18 = vrot.slane %v158_v52, %v930_v38  ;;  %v265_v19 = vcombine.high %v261_v11, %v261_v11  ;;  %v181_v20 = vrot.slane %v165_v1, %v930_v38 }
 0x103   :  { %704 = vst.sshfl [vmem:[%s1205_s3 + $0xd] sm:$0x1 pattern:$0x73625140] %v496_v63  ;;  %277 = vst [vmem:[%s1205_s3 + $0x19] sm:$0x1] %v264_v13  ;;  %v188_v21 = vrot.slane %v166_v2, %v930_v38  ;;  %v195_v22 = vrot.slane %v167_v14, %v930_v38  ;;  %v529_v23 = vcombine.high %v525_v15, %v525_v15 }
 0x104   :  { %684 = vst.sshfl [vmem:[%s1205_s3 + $0x8] sm:$0x1 pattern:$0x73625140] %v166_v2  ;;  %280 = vst [vmem:[%s1205_s3 + $0x31] sm:$0x1] %v263_v12  ;;  %v196_v24 = vcombine.high %v174_v18, %v174_v18  ;;  %v429_v25 = vrot.slane %v415_v53, %v930_v38  ;;  %v430_v26 = vcombine.high %v422_v54, %v422_v54 }
 0x105   :  { %685 = vst.sshfl [vmem:[%s1205_s3 + $0x20] sm:$0x1 pattern:$0x73625140] %v165_v1  ;;  %541 = vst [vmem:[%s1205_s3 + $0x1d] sm:$0x1] %v528_v17  ;;  %v197_v27 = vcombine.high %v181_v20, %v181_v20  ;;  %v198_v28 = vcombine.high %v188_v21, %v188_v21  ;;  %v199_v29 = vcombine.high %v195_v22, %v195_v22 }
 0x106   :  { %690 = vst.sshfl [vmem:[%s1205_s3 + $0x29] sm:$0x1 pattern:$0x73625140] %v233_v3  ;;  %544 = vst [vmem:[%s1205_s3 + $0x35] sm:$0x1] %v527_v16  ;;  %v438_v30 = vrot.slane %v422_v54, %v930_v38  ;;  %v431_v31 = vcombine.high %v429_v25, %v429_v25  ;;  %v445_v32 = vrot.slane %v429_v25, %v930_v38 }
 0x107   :  { %706 = vst.sshfl [vmem:[%s1205_s3 + $0x2d] sm:$0x1 pattern:$0x73625140] %v497_v7  ;;  %281 = vst [vmem:[%s1205_s3 + $0x39] sm:$0x1] %v265_v19  ;;  %v452_v33 = vrot.slane %v430_v26, %v930_v38  ;;  %v127_v34 = vadd.f32 %v945_v55, %v928_v37  ;;  %v147_v36 = vadd.f32 %v947_v56, %v928_v37 }
 0x108   :  { %686 = vst.sshfl [vmem:[%s1205_s3 + $0x28] sm:$0x1 pattern:$0x73625140] %v167_v14  ;;  %545 = vst [vmem:[%s1205_s3 + $0x3d] sm:$0x1] %v529_v23  ;;  %v460_v35 = vcombine.high %v438_v30, %v438_v30  ;;  %v122_v39 = vadd.f32 %v928_v37, %v958_v61  ;;  %v1061_v40 = vadd.f32 %v928_v37, %v960_v62 }
 0x109   :  { %210 = vst [vmem:[%s1205_s3 + $0x10] sm:$0x1] %v196_v24  ;;  %700 = vst.sshfl [vmem:[%s1205_s3 + $0xc] sm:$0x1 pattern:$0x73625140] %v430_v26  ;;  %v459_v41 = vrot.slane %v431_v31, %v930_v38  ;;  %v461_v42 = vcombine.high %v445_v32, %v445_v32  ;;  %v462_v43 = vcombine.high %v452_v33, %v452_v33 }
 0x10a   :  { %701 = vst.sshfl [vmem:[%s1205_s3 + $0x24] sm:$0x1 pattern:$0x73625140] %v429_v25  ;;  %211 = vst [vmem:[%s1205_s3 + $0x18] sm:$0x1] %v198_v28  ;;  %v349_v44 = vcombine.high %v127_v34, %v127_v34  ;;  %v356_v45 = vrot.slane %v127_v34, %v930_v38  ;;  %v613_v46 = vcombine.high %v147_v36, %v147_v36 }
 0x10b   :  { %214 = vst [vmem:[%s1205_s3 + $0x30] sm:$0x1] %v197_v27  ;;  %215 = vst [vmem:[%s1205_s3 + $0x38] sm:$0x1] %v199_v29  ;;  %v620_v47 = vrot.slane %v147_v36, %v930_v38  ;;  %v283_v37 = vcombine.high %v122_v39, %v122_v39  ;;  %v463_v48 = vcombine.high %v459_v41, %v459_v41 }
 0x10c   :  { %702 = vst.sshfl [vmem:[%s1205_s3 + $0x2c] sm:$0x1 pattern:$0x73625140] %v431_v31  ;;  %474 = vst [vmem:[%s1205_s3 + $0x14] sm:$0x1] %v460_v35  ;;  %v363_v49 = vrot.slane %v349_v44, %v930_v38  ;;  %v290_v50 = vrot.slane %v122_v39, %v930_v38  ;;  %v547_v51 = vcombine.high %v1061_v40, %v1061_v40 }
 0x10d   :  { %475 = vst [vmem:[%s1205_s3 + $0x1c] sm:$0x1] %v462_v43  ;;  %478 = vst [vmem:[%s1205_s3 + $0x34] sm:$0x1] %v461_v42  ;;  %v364_v52 = vcombine.high %v356_v45, %v356_v45  ;;  %v372_v53 = vrot.slane %v356_v45, %v930_v38  ;;  %v627_v54 = vrot.slane %v613_v46, %v930_v38 }
 0x10e   :  { %695 = vst.sshfl [vmem:[%s1205_s3 + $0x3] sm:$0x1 pattern:$0x73625140] %v356_v45  ;;  %v628_v55 = vcombine.high %v620_v47, %v620_v47  ;;  %479 = vst [vmem:[%s1205_s3 + $0x3c] sm:$0x1] %v463_v48  ;;  %v365_v56 = vcombine.high %v363_v49, %v363_v49  ;;  %v379_v57 = vrot.slane %v363_v49, %v930_v38 }
 0x10f   :  { %711 = vst.sshfl [vmem:[%s1205_s3 + $0x7] sm:$0x1 pattern:$0x73625140] %v620_v47  ;;  %v636_v58 = vrot.slane %v620_v47, %v930_v38  ;;  %v297_v59 = vrot.slane %v283_v37, %v930_v38  ;;  %v386_v60 = vrot.slane %v364_v52, %v930_v38  ;;  %v394_v61 = vcombine.high %v372_v53, %v372_v53 }
 0x110   :  { %697 = vst.sshfl [vmem:[%s1205_s3 + $0x23] sm:$0x1 pattern:$0x73625140] %v363_v49  ;;  %v629_v62 = vcombine.high %v627_v54, %v627_v54  ;;  %v643_v63 = vrot.slane %v627_v54, %v930_v38  ;;  %v393_v0 = vrot.slane %v365_v56, %v930_v38  ;;  %v395_v1 = vcombine.high %v379_v57, %v379_v57 }
 0x111   :  { %691 = vst.sshfl [vmem:[%s1205_s3 + $0x2] sm:$0x1 pattern:$0x73625140] %v290_v50  ;;  %v650_v2 = vrot.slane %v628_v55, %v930_v38  ;;  %v658_v3 = vcombine.high %v636_v58, %v636_v58  ;;  %v396_v4 = vcombine.high %v386_v60, %v386_v60  ;;  %408 = vst [vmem:[%s1205_s3 + $0x13] sm:$0x1] %v394_v61 }
 0x112   :  { %696 = vst.sshfl [vmem:[%s1205_s3 + $0xb] sm:$0x1 pattern:$0x73625140] %v364_v52  ;;  %v657_v5 = vrot.slane %v629_v62, %v930_v38  ;;  %v659_v6 = vcombine.high %v643_v63, %v643_v63  ;;  %v298_v7 = vcombine.high %v290_v50, %v290_v50  ;;  %v397_v8 = vcombine.high %v393_v0, %v393_v0 }
 0x113   :  { %712 = vst.sshfl [vmem:[%s1205_s3 + $0xf] sm:$0x1 pattern:$0x73625140] %v628_v55  ;;  %412 = vst [vmem:[%s1205_s3 + $0x33] sm:$0x1] %v395_v1  ;;  %v660_v9 = vcombine.high %v650_v2, %v650_v2  ;;  %v299_v10 = vcombine.high %v297_v59, %v297_v59  ;;  %v306_v11 = vrot.slane %v290_v50, %v930_v38 }
 0x114   :  { %713 = vst.sshfl [vmem:[%s1205_s3 + $0x27] sm:$0x1 pattern:$0x73625140] %v627_v54  ;;  %672 = vst [vmem:[%s1205_s3 + $0x17] sm:$0x1] %v658_v3  ;;  %v661_v12 = vcombine.high %v657_v5, %v657_v5  ;;  %v313_v13 = vrot.slane %v297_v59, %v930_v38  ;;  %v320_v14 = vrot.slane %v298_v7, %v930_v38 }
 0x115   :  { %698 = vst.sshfl [vmem:[%s1205_s3 + $0x2b] sm:$0x1 pattern:$0x73625140] %v365_v56  ;;  %409 = vst [vmem:[%s1205_s3 + $0x1b] sm:$0x1] %v396_v4  ;;  %v554_v15 = vrot.slane %v1061_v40, %v930_v38  ;;  %v327_v16 = vrot.slane %v299_v10, %v930_v38  ;;  %v328_v17 = vcombine.high %v306_v11, %v306_v11 }
 0x116   :  { %693 = vst.sshfl [vmem:[%s1205_s3 + $0x22] sm:$0x1 pattern:$0x73625140] %v297_v59  ;;  %676 = vst [vmem:[%s1205_s3 + $0x37] sm:$0x1] %v659_v6  ;;  %v561_v18 = vrot.slane %v547_v51, %v930_v38  ;;  %v329_v19 = vcombine.high %v313_v13, %v313_v13  ;;  %v330_v20 = vcombine.high %v320_v14, %v320_v14 }
 0x117   :  { %714 = vst.sshfl [vmem:[%s1205_s3 + $0x2f] sm:$0x1 pattern:$0x73625140] %v629_v62  ;;  %413 = vst [vmem:[%s1205_s3 + $0x3b] sm:$0x1] %v397_v8  ;;  %v562_v21 = vcombine.high %v554_v15, %v554_v15  ;;  %v570_v22 = vrot.slane %v554_v15, %v930_v38  ;;  %v331_v23 = vcombine.high %v327_v16, %v327_v16 }
 0x118   :  { %692 = vst.sshfl [vmem:[%s1205_s3 + $0xa] sm:$0x1 pattern:$0x73625140] %v298_v7  ;;  %673 = vst [vmem:[%s1205_s3 + $0x1f] sm:$0x1] %v660_v9  ;;  %v563_v24 = vcombine.high %v561_v18, %v561_v18  ;;  %v577_v25 = vrot.slane %v561_v18, %v930_v38 }
 0x119   :  { %694 = vst.sshfl [vmem:[%s1205_s3 + $0x2a] sm:$0x1 pattern:$0x73625140] %v299_v10  ;;  %677 = vst [vmem:[%s1205_s3 + $0x3f] sm:$0x1] %v661_v12  ;;  %v584_v26 = vrot.slane %v562_v21, %v930_v38  ;;  %v592_v27 = vcombine.high %v570_v22, %v570_v22 }
 0x11a   :  { %707 = vst.sshfl [vmem:[%s1205_s3 + $0x6] sm:$0x1 pattern:$0x73625140] %v554_v15  ;;  %342 = vst [vmem:[%s1205_s3 + $0x12] sm:$0x1] %v328_v17  ;;  %v591_v28 = vrot.slane %v563_v24, %v930_v38  ;;  %v593_v29 = vcombine.high %v577_v25, %v577_v25 }
 0x11b   :  { %709 = vst.sshfl [vmem:[%s1205_s3 + $0x26] sm:$0x1 pattern:$0x73625140] %v561_v18  ;;  %343 = vst [vmem:[%s1205_s3 + $0x1a] sm:$0x1] %v330_v20  ;;  %v594_v30 = vcombine.high %v584_v26, %v584_v26 }
 0x11c   :  { %346 = vst [vmem:[%s1205_s3 + $0x32] sm:$0x1] %v329_v19  ;;  %708 = vst.sshfl [vmem:[%s1205_s3 + $0xe] sm:$0x1 pattern:$0x73625140] %v562_v21  ;;  %v595_v31 = vcombine.high %v591_v28, %v591_v28 }
 0x11d   :  { %347 = vst [vmem:[%s1205_s3 + $0x3a] sm:$0x1] %v331_v23  ;;  %710 = vst.sshfl [vmem:[%s1205_s3 + $0x2e] sm:$0x1 pattern:$0x73625140] %v563_v24 }
 0x11e   :  { %606 = vst [vmem:[%s1205_s3 + $0x16] sm:$0x1] %v592_v27  ;;  %610 = vst [vmem:[%s1205_s3 + $0x36] sm:$0x1] %v593_v29 }
 0x11f   :  { %607 = vst [vmem:[%s1205_s3 + $0x1e] sm:$0x1] %v594_v30  ;;  %611 = vst [vmem:[%s1205_s3 + $0x3e] sm:$0x1] %v595_v31 }

</bundles_post_ra>
